<compile_context>
chip_gen: v7x
topology: tpu7x:2x2x1
jax: 0.10.0
libtpu: 0.0.40
codegen_flags: <defaults>
</compile_context>

<pallas_src>
import functools

import jax
import jax.numpy as jnp
from jax.experimental import pallas as pl
from jax.experimental.pallas import tpu as pltpu

ENCODER_DIM = 32   # hp.encoder_dim
FILTER_SIZE = 32   # hp.duration_predictor_filter_size
KERNEL = 3         # hp.duration_predictor_kernel_size
LN_EPS = 1e-5


# ----------------------------------------------------------------------------
# In-kernel helpers
# ----------------------------------------------------------------------------
def _conv3_ln_relu(h, w3, b, g, be):
    """Conv1d(k=3, pad=1) + LayerNorm(channels) + ReLU in (C, L) orientation.

    h:  (C_in, L)   time on lanes, channels on sublanes
    w3: (C_out, 3*C_in) with column blocks [k=0 | k=1 | k=2], i.e.
        w3[o, k*C_in + i] == torch_conv.weight[o, i, k]
    b, g, be: (C_out, 1)
    """
    c_in, l = h.shape
    col = jax.lax.broadcasted_iota(jnp.int32, (c_in, l), 1)
    # Shifted copies via XLU lane rolls (shift must be >= 0) + edge masks.
    h_prev = jnp.where(col == 0, 0.0, pltpu.roll(h, 1, axis=1))          # h[:, t-1]
    h_next = jnp.where(col == l - 1, 0.0, pltpu.roll(h, l - 1, axis=1))  # h[:, t+1]
    h3 = jnp.concatenate([h_prev, h, h_next], axis=0)                    # (3*C_in, L)
    # bf16 MXU operands, f32 accumulation; LayerNorm right after re-normalises.
    y = jnp.dot(w3.astype(jnp.bfloat16), h3.astype(jnp.bfloat16),
                preferred_element_type=jnp.float32) + b                  # (C_out, L)
    # LayerNorm over channels (sublane axis), biased variance like torch.
    mu = jnp.mean(y, axis=0, keepdims=True)
    var = jnp.mean((y - mu) ** 2, axis=0, keepdims=True)
    y = (y - mu) * jax.lax.rsqrt(var + LN_EPS) * g + be
    return jnp.maximum(y, 0.0)                                           # ReLU (dropout=eval)


def _inclusive_lane_cumsum(v):
    """Hillis-Steele inclusive prefix sum along the lane (last) axis, int32."""
    l = v.shape[-1]
    col = jax.lax.broadcasted_iota(jnp.int32, v.shape, 1)
    s = v
    shift = 1
    while shift < l:
        s = s + jnp.where(col >= shift, pltpu.roll(s, shift, axis=1), 0)
        shift *= 2
    return s


# ----------------------------------------------------------------------------
# Fused kernel: duration predictor + rounding + cumsum + length regulation
# ----------------------------------------------------------------------------
def _lr_fused_kernel(xt_ref, w1_ref, b1_ref, g1_ref, be1_ref,
                     w2_ref, b2_ref, g2_ref, be2_ref, wl_ref, bl_ref,
                     out_ref, dur_ref, tot_ref, *, alpha, sub_t):
    xt = xt_ref[...]                                                     # (D, L) f32
    d, l = xt.shape

    # ---- duration predictor (channel-major, time on lanes) ----
    h = _conv3_ln_relu(xt, w1_ref[...], b1_ref[...], g1_ref[...], be1_ref[...])
    h = _conv3_ln_relu(h, w2_ref[...], b2_ref[...], g2_ref[...], be2_ref[...])
    # Linear(F, 1) + ReLU as a sublane reduction -> lane-dense (1, L) row.
    dp = jnp.sum(h * wl_ref[...], axis=0, keepdims=True) + bl_ref[...]
    dp = jnp.maximum(dp, 0.0)
    # ((dp + 0.5) * alpha).int(): truncation toward zero == floor (dp >= 0, alpha > 0).
    dur = ((dp + 0.5) * alpha).astype(jnp.int32)                         # (1, L)
    end = _inclusive_lane_cumsum(dur)                                    # inclusive cumsum
    start = end - dur
    dur_ref[...] = dur                                                   # lane-dense int32 row
    tot_ref[...] = end[:, l - 1:]                                        # total frames (1, 1)

    # ---- length regulation, channel-major output (lane-dense stores) ----
    t_max = out_ref.shape[1]
    t_iota = jax.lax.broadcasted_iota(jnp.int32, (sub_t, l), 0)          # hoisted once
    # Statically unrolled sub-blocks of `sub_t` output frames: keeps the
    # alignment intermediate at (sub_t, L) ~ 16 vregs instead of (t_max, L).
    for i in range(t_max // sub_t):
        t0 = i * sub_t
        align = jnp.logical_and(t_iota >= start - t0,
                                t_iota < end - t0).astype(jnp.float32)   # (sub_t, L)
        # out^T block: (D, sub_t) = x^T (D, L) contracted with align over L.
        blk = jax.lax.dot_general(xt, align, (((1,), (1,)), ((), ())),
                                  preferred_element_type=jnp.float32)
        out_ref[:, t0:t0 + sub_t] = blk.astype(out_ref.dtype)


# ----------------------------------------------------------------------------
# Wrapper (fully traceable; no host sync)
# ----------------------------------------------------------------------------
def length_regulator_forward(x, params, *, alpha=1.0, t_max=512, sub_t=128):
    """LengthRegulator.forward (inference path: target=None, eval mode).

    Returns (output, mel_pos, mel_len, durations) with `output` zero-padded to
    the static length `t_max` and `mel_len` the true (traced, clamped) length.
    """
    # TODO(synk): torch's data-dependent expand_max_len has no static-shape
    # equivalent; frames beyond t_max are truncated and the rest zero-padded.
    assert alpha > 0.0, "alpha must be > 0 for .int() truncation to equal floor"
    b_sz, seq_l, d = x.shape
    assert t_max % sub_t == 0, "t_max must be a multiple of sub_t"

    # Single channel-major orientation feeds both predictor and LR matmul.
    x_t = jnp.swapaxes(x, 1, 2)                                          # (B, D, L)

    def const_spec(a):
        nd = a.ndim
        return pl.BlockSpec(a.shape, lambda b, _nd=nd: (0,) * _nd)

    in_specs = [pl.BlockSpec((None, d, seq_l), lambda b: (b, 0, 0))] + [
        const_spec(params[k]) for k in
        ("w1", "b1", "g1", "be1", "w2", "b2", "g2", "be2", "wl", "bl")]
    out_specs = (
        pl.BlockSpec((None, d, t_max), lambda b: (b, 0, 0)),             # output^T (lane-dense)
        pl.BlockSpec((None, 1, seq_l), lambda b: (b, 0, 0)),             # int durations
        pl.BlockSpec((None, 1, 1), lambda b: (b, 0, 0)),                 # total frames / batch
    )
    out_shape = (
        jax.ShapeDtypeStruct((b_sz, d, t_max), x.dtype),
        jax.ShapeDtypeStruct((b_sz, 1, seq_l), jnp.int32),
        jax.ShapeDtypeStruct((b_sz, 1, 1), jnp.int32),
    )

    out_t, dur, tot = pl.pallas_call(
        functools.partial(_lr_fused_kernel, alpha=float(alpha), sub_t=sub_t),
        grid=(b_sz,),
        in_specs=in_specs,
        out_specs=out_specs,
        out_shape=out_shape,
        compiler_params=pltpu.CompilerParams(dimension_semantics=("parallel",)),
    )(x_t, params["w1"], params["b1"], params["g1"], params["be1"],
      params["w2"], params["b2"], params["g2"], params["be2"],
      params["wl"], params["bl"])

    output = jnp.swapaxes(out_t, 1, 2)                                   # (B, t_max, D)
    durations = dur[:, 0, :]                                             # (B, L) int32
    mel_len = jnp.minimum(jnp.max(tot[:, 0, 0]), t_max)                  # clamped to t_max
    positions = jnp.arange(1, t_max + 1, dtype=jnp.int32)
    mel_pos = jnp.where(positions <= mel_len, positions, 0)[None, :]     # (1, t_max)
    return output, mel_pos, mel_len, durations


# ----------------------------------------------------------------------------
# Pure-JAX reference (for correctness checking only)
# ----------------------------------------------------------------------------
def _reference_lr(x, dur, t_max):
    end = jnp.cumsum(dur, axis=-1)
    start = end - dur
    t = jnp.arange(t_max, dtype=jnp.int32)[None, :, None]                # (1, T, 1)
    align = jnp.logical_and(t >= start[:, None, :], t < end[:, None, :]).astype(x.dtype)
    return jnp.einsum("btl,bld->btd", align, x,
                      precision=jax.lax.Precision.HIGHEST)


def _reference_forward(x, params, alpha, t_max):
    hi = jax.lax.Precision.HIGHEST
    b_sz, seq_l, _ = x.shape

    def conv_ln_relu(h, w3, b, g, be):
        zero = jnp.zeros((b_sz, 1, h.shape[-1]), h.dtype)
        h_prev = jnp.concatenate([zero, h[:, :-1]], axis=1)
        h_next = jnp.concatenate([h[:, 1:], zero], axis=1)
        h3 = jnp.concatenate([h_prev, h, h_next], axis=-1)               # (B, L, 3C)
        y = jnp.einsum("blc,fc->blf", h3, w3, precision=hi) + b[:, 0]
        mu = y.mean(-1, keepdims=True)
        var = ((y - mu) ** 2).mean(-1, keepdims=True)
        y = (y - mu) * jax.lax.rsqrt(var + LN_EPS) * g[:, 0] + be[:, 0]
        return jnp.maximum(y, 0.0)

    h = conv_ln_relu(x, params["w1"], params["b1"], params["g1"], params["be1"])
    h = conv_ln_relu(h, params["w2"], params["b2"], params["g2"], params["be2"])
    dp = jnp.einsum("blf,fo->blo", h, params["wl"], precision=hi)[..., 0]
    dp = jnp.maximum(dp + params["bl"][0, 0], 0.0)                       # (B, L)
    dur = ((dp + 0.5) * alpha).astype(jnp.int32)
    return _reference_lr(x, dur, t_max), dur


if __name__ == "__main__":
    import numpy as np

    key = jax.random.PRNGKey(0)
    B, L = 2, 128                      # batch, phoneme length
    D, F = ENCODER_DIM, FILTER_SIZE
    T_MAX, SUB_T = 512, 128            # static padded mel length, LR sub-block
    k_x, k_w1, k_w2, k_wl = jax.random.split(key, 4)

    x = jax.random.normal(k_x, (B, L, D), jnp.float32)

    def xavier_uniform(k, shape, fan_in, fan_out):
        bound = (6.0 / (fan_in + fan_out)) ** 0.5
        return jax.random.uniform(k, shape, jnp.float32, -bound, bound)

    # Conv weights stored as (C_out, 3*C_in): w3[o, k*C_in + i] == torch w[o, i, k].
    params = dict(
        w1=xavier_uniform(k_w1, (F, KERNEL * D), D * KERNEL, F * KERNEL),
        b1=jnp.zeros((F, 1), jnp.float32),
        g1=jnp.ones((F, 1), jnp.float32),
        be1=jnp.zeros((F, 1), jnp.float32),
        w2=xavier_uniform(k_w2, (F, KERNEL * F), F * KERNEL, F * KERNEL),
        b2=jnp.zeros((F, 1), jnp.float32),
        g2=jnp.ones((F, 1), jnp.float32),
        be2=jnp.zeros((F, 1), jnp.float32),
        wl=xavier_uniform(k_wl, (F, 1), F, 1),
        # positive bias so synthetic durations are > 0 with random weights
        bl=jnp.full((1, 1), 2.0, jnp.float32),
    )

    fwd = jax.jit(functools.partial(length_regulator_forward,
                                    alpha=1.0, t_max=T_MAX, sub_t=SUB_T))
    output, mel_pos, mel_len, durations = fwd(x, params)
    jax.block_until_ready((output, mel_pos, mel_len, durations))

    # ---- correctness checks against a pure-JAX reference ----
    ref_out, ref_dur = _reference_forward(x, params, 1.0, T_MAX)
    # Integer durations may only flip at a rounding boundary (bf16 conv matmuls).
    assert int(jnp.max(jnp.abs(durations - ref_dur))) <= 1, "duration predictor mismatch"
    # LR / alignment path must match when replayed with the kernel's durations
    # (tolerance accommodates the MXU's multi-pass f32 matmul behaviour).
    replay = _reference_lr(x, durations, T_MAX)
    np.testing.assert_allclose(np.asarray(output), np.asarray(replay),
                               atol=1e-2, rtol=1e-2)
    if bool(jnp.all(durations == ref_dur)):
        np.testing.assert_allclose(np.asarray(output), np.asarray(ref_out),
                                   atol=1e-2, rtol=1e-2)
    assert int(mel_len) <= T_MAX

    print("KERNEL_OK")
</pallas_src>

<mosaic_0001>
module attributes {stable_mosaic.version = 11 : i64} {
  func.func @_lr_fused_kernel(%arg0: i32, %arg1: memref<1x32x128xf32, #tpu.memory_space<vmem>>, %arg2: memref<32x96xf32, #tpu.memory_space<vmem>>, %arg3: memref<32x1xf32, #tpu.memory_space<vmem>>, %arg4: memref<32x1xf32, #tpu.memory_space<vmem>>, %arg5: memref<32x1xf32, #tpu.memory_space<vmem>>, %arg6: memref<32x96xf32, #tpu.memory_space<vmem>>, %arg7: memref<32x1xf32, #tpu.memory_space<vmem>>, %arg8: memref<32x1xf32, #tpu.memory_space<vmem>>, %arg9: memref<32x1xf32, #tpu.memory_space<vmem>>, %arg10: memref<32x1xf32, #tpu.memory_space<vmem>>, %arg11: memref<1x1xf32, #tpu.memory_space<vmem>>, %arg12: memref<1x32x512xf32, #tpu.memory_space<vmem>>, %arg13: memref<1x1x128xi32, #tpu.memory_space<vmem>>, %arg14: memref<1x1x1xi32, #tpu.memory_space<vmem>>) attributes {dimension_semantics = [#tpu.dimension_semantics<parallel>], iteration_bounds = array<i64: 2>, scalar_prefetch = 0 : i64, scratch_operands = 0 : i64, tpu.core_type = #tpu.core_type<tc>, window_params = [{transform_indices = @transform_0, window_bounds = array<i64: 1, 32, 128>}, {pipeline_mode = #tpu.pipeline_mode<synchronous>, transform_indices = @transform_1, window_bounds = array<i64: 32, 96>}, {pipeline_mode = #tpu.pipeline_mode<synchronous>, transform_indices = @transform_2, window_bounds = array<i64: 32, 1>}, {pipeline_mode = #tpu.pipeline_mode<synchronous>, transform_indices = @transform_3, window_bounds = array<i64: 32, 1>}, {pipeline_mode = #tpu.pipeline_mode<synchronous>, transform_indices = @transform_4, window_bounds = array<i64: 32, 1>}, {pipeline_mode = #tpu.pipeline_mode<synchronous>, transform_indices = @transform_5, window_bounds = array<i64: 32, 96>}, {pipeline_mode = #tpu.pipeline_mode<synchronous>, transform_indices = @transform_6, window_bounds = array<i64: 32, 1>}, {pipeline_mode = #tpu.pipeline_mode<synchronous>, transform_indices = @transform_7, window_bounds = array<i64: 32, 1>}, {pipeline_mode = #tpu.pipeline_mode<synchronous>, transform_indices = @transform_8, window_bounds = array<i64: 32, 1>}, {pipeline_mode = #tpu.pipeline_mode<synchronous>, transform_indices = @transform_9, window_bounds = array<i64: 32, 1>}, {pipeline_mode = #tpu.pipeline_mode<synchronous>, transform_indices = @transform_10, window_bounds = array<i64: 1, 1>}, {transform_indices = @transform_11, window_bounds = array<i64: 1, 32, 512>}, {transform_indices = @transform_12, window_bounds = array<i64: 1, 1, 128>}, {transform_indices = @transform_13, window_bounds = array<i64: 1, 1, 1>}]} {
    %c0 = arith.constant 0 : index
    %c0_0 = arith.constant 0 : index
    %c0_1 = arith.constant 0 : index
    %0 = vector.load %arg1[%c0, %c0_0, %c0_1] : memref<1x32x128xf32, #tpu.memory_space<vmem>>, vector<1x32x128xf32>
    %1 = vector.shape_cast %0 : vector<1x32x128xf32> to vector<32x128xf32>
    %c0_2 = arith.constant 0 : index
    %c0_3 = arith.constant 0 : index
    %2 = vector.load %arg2[%c0_2, %c0_3] : memref<32x96xf32, #tpu.memory_space<vmem>>, vector<32x96xf32>
    %c0_4 = arith.constant 0 : index
    %c0_5 = arith.constant 0 : index
    %3 = vector.load %arg3[%c0_4, %c0_5] : memref<32x1xf32, #tpu.memory_space<vmem>>, vector<32x1xf32>
    %c0_6 = arith.constant 0 : index
    %c0_7 = arith.constant 0 : index
    %4 = vector.load %arg4[%c0_6, %c0_7] : memref<32x1xf32, #tpu.memory_space<vmem>>, vector<32x1xf32>
    %c0_8 = arith.constant 0 : index
    %c0_9 = arith.constant 0 : index
    %5 = vector.load %arg5[%c0_8, %c0_9] : memref<32x1xf32, #tpu.memory_space<vmem>>, vector<32x1xf32>
    %6 = tpu.iota {dimensions = array<i32: 1>} : vector<32x128xi32>
    %c0_i32 = arith.constant 0 : i32
    %7 = vector.broadcast %c0_i32 : i32 to vector<32x128xi32>
    %8 = arith.cmpi eq, %6, %7 : vector<32x128xi32>
    %c1_i32 = arith.constant 1 : i32
    %9 = tpu.dynamic_rotate %1 by %c1_i32 dim 1 : vector<32x128xf32>, i32 -> vector<32x128xf32>
    %cst = arith.constant 0.000000e+00 : f32
    %10 = vector.broadcast %cst : f32 to vector<32x128xf32>
    %11 = arith.select %8, %10, %9 : vector<32x128xi1>, vector<32x128xf32>
    %c127_i32 = arith.constant 127 : i32
    %12 = vector.broadcast %c127_i32 : i32 to vector<32x128xi32>
    %13 = arith.cmpi eq, %6, %12 : vector<32x128xi32>
    %c127_i32_10 = arith.constant 127 : i32
    %14 = tpu.dynamic_rotate %1 by %c127_i32_10 dim 1 : vector<32x128xf32>, i32 -> vector<32x128xf32>
    %cst_11 = arith.constant 0.000000e+00 : f32
    %15 = vector.broadcast %cst_11 : f32 to vector<32x128xf32>
    %16 = arith.select %13, %15, %14 : vector<32x128xi1>, vector<32x128xf32>
    %17 = tpu.concatenate %11, %1, %16 in 0 : vector<32x128xf32>, vector<32x128xf32>, vector<32x128xf32> -> vector<96x128xf32>
    %18 = arith.truncf %2 : vector<32x96xf32> to vector<32x96xbf16>
    %19 = arith.truncf %17 : vector<96x128xf32> to vector<96x128xbf16>
    %cst_12 = arith.constant dense<0.000000e+00> : vector<32x128xf32>
    %20 = tpu.matmul %18, %19, %cst_12 {dimension_numbers = #tpu.dot_dimension_numbers<[1], [0], [0], [1], [0, 0, 1, 1], [], []>} : vector<32x96xbf16>, vector<96x128xbf16>, vector<32x128xf32> -> vector<32x128xf32>
    %21 = vector.broadcast %3 : vector<32x1xf32> to vector<32x128xf32>
    %22 = arith.addf %20, %21 : vector<32x128xf32>
    %cst_13 = arith.constant dense<0.000000e+00> : vector<128xf32>
    %23 = vector.multi_reduction <add>, %22, %cst_13 [0] : vector<32x128xf32> to vector<128xf32>
    %24 = vector.shape_cast %23 : vector<128xf32> to vector<1x128xf32>
    %cst_14 = arith.constant 3.200000e+01 : f32
    %25 = vector.broadcast %cst_14 : f32 to vector<1x128xf32>
    %26 = arith.divf %24, %25 : vector<1x128xf32>
    %27 = vector.broadcast %26 : vector<1x128xf32> to vector<32x128xf32>
    %28 = arith.subf %22, %27 : vector<32x128xf32>
    %29 = arith.mulf %28, %28 : vector<32x128xf32>
    %cst_15 = arith.constant dense<0.000000e+00> : vector<128xf32>
    %30 = vector.multi_reduction <add>, %29, %cst_15 [0] : vector<32x128xf32> to vector<128xf32>
    %31 = vector.shape_cast %30 : vector<128xf32> to vector<1x128xf32>
    %cst_16 = arith.constant 3.200000e+01 : f32
    %32 = vector.broadcast %cst_16 : f32 to vector<1x128xf32>
    %33 = arith.divf %31, %32 : vector<1x128xf32>
    %34 = vector.broadcast %26 : vector<1x128xf32> to vector<32x128xf32>
    %35 = arith.subf %22, %34 : vector<32x128xf32>
    %cst_17 = arith.constant 9.99999974E-6 : f32
    %36 = vector.broadcast %cst_17 : f32 to vector<1x128xf32>
    %37 = arith.addf %33, %36 : vector<1x128xf32>
    %38 = math.rsqrt %37 : vector<1x128xf32>
    %39 = vector.broadcast %38 : vector<1x128xf32> to vector<32x128xf32>
    %40 = arith.mulf %35, %39 : vector<32x128xf32>
    %41 = vector.broadcast %4 : vector<32x1xf32> to vector<32x128xf32>
    %42 = arith.mulf %40, %41 : vector<32x128xf32>
    %43 = vector.broadcast %5 : vector<32x1xf32> to vector<32x128xf32>
    %44 = arith.addf %42, %43 : vector<32x128xf32>
    %cst_18 = arith.constant 0.000000e+00 : f32
    %45 = vector.broadcast %cst_18 : f32 to vector<32x128xf32>
    %46 = arith.maximumf %44, %45 : vector<32x128xf32>
    %c0_19 = arith.constant 0 : index
    %c0_20 = arith.constant 0 : index
    %47 = vector.load %arg6[%c0_19, %c0_20] : memref<32x96xf32, #tpu.memory_space<vmem>>, vector<32x96xf32>
    %c0_21 = arith.constant 0 : index
    %c0_22 = arith.constant 0 : index
    %48 = vector.load %arg7[%c0_21, %c0_22] : memref<32x1xf32, #tpu.memory_space<vmem>>, vector<32x1xf32>
    %c0_23 = arith.constant 0 : index
    %c0_24 = arith.constant 0 : index
    %49 = vector.load %arg8[%c0_23, %c0_24] : memref<32x1xf32, #tpu.memory_space<vmem>>, vector<32x1xf32>
    %c0_25 = arith.constant 0 : index
    %c0_26 = arith.constant 0 : index
    %50 = vector.load %arg9[%c0_25, %c0_26] : memref<32x1xf32, #tpu.memory_space<vmem>>, vector<32x1xf32>
    %51 = tpu.iota {dimensions = array<i32: 1>} : vector<32x128xi32>
    %c0_i32_27 = arith.constant 0 : i32
    %52 = vector.broadcast %c0_i32_27 : i32 to vector<32x128xi32>
    %53 = arith.cmpi eq, %51, %52 : vector<32x128xi32>
    %c1_i32_28 = arith.constant 1 : i32
    %54 = tpu.dynamic_rotate %46 by %c1_i32_28 dim 1 : vector<32x128xf32>, i32 -> vector<32x128xf32>
    %cst_29 = arith.constant 0.000000e+00 : f32
    %55 = vector.broadcast %cst_29 : f32 to vector<32x128xf32>
    %56 = arith.select %53, %55, %54 : vector<32x128xi1>, vector<32x128xf32>
    %c127_i32_30 = arith.constant 127 : i32
    %57 = vector.broadcast %c127_i32_30 : i32 to vector<32x128xi32>
    %58 = arith.cmpi eq, %51, %57 : vector<32x128xi32>
    %c127_i32_31 = arith.constant 127 : i32
    %59 = tpu.dynamic_rotate %46 by %c127_i32_31 dim 1 : vector<32x128xf32>, i32 -> vector<32x128xf32>
    %cst_32 = arith.constant 0.000000e+00 : f32
    %60 = vector.broadcast %cst_32 : f32 to vector<32x128xf32>
    %61 = arith.select %58, %60, %59 : vector<32x128xi1>, vector<32x128xf32>
    %62 = tpu.concatenate %56, %46, %61 in 0 : vector<32x128xf32>, vector<32x128xf32>, vector<32x128xf32> -> vector<96x128xf32>
    %63 = arith.truncf %47 : vector<32x96xf32> to vector<32x96xbf16>
    %64 = arith.truncf %62 : vector<96x128xf32> to vector<96x128xbf16>
    %cst_33 = arith.constant dense<0.000000e+00> : vector<32x128xf32>
    %65 = tpu.matmul %63, %64, %cst_33 {dimension_numbers = #tpu.dot_dimension_numbers<[1], [0], [0], [1], [0, 0, 1, 1], [], []>} : vector<32x96xbf16>, vector<96x128xbf16>, vector<32x128xf32> -> vector<32x128xf32>
    %66 = vector.broadcast %48 : vector<32x1xf32> to vector<32x128xf32>
    %67 = arith.addf %65, %66 : vector<32x128xf32>
    %cst_34 = arith.constant dense<0.000000e+00> : vector<128xf32>
    %68 = vector.multi_reduction <add>, %67, %cst_34 [0] : vector<32x128xf32> to vector<128xf32>
    %69 = vector.shape_cast %68 : vector<128xf32> to vector<1x128xf32>
    %cst_35 = arith.constant 3.200000e+01 : f32
    %70 = vector.broadcast %cst_35 : f32 to vector<1x128xf32>
    %71 = arith.divf %69, %70 : vector<1x128xf32>
    %72 = vector.broadcast %71 : vector<1x128xf32> to vector<32x128xf32>
    %73 = arith.subf %67, %72 : vector<32x128xf32>
    %74 = arith.mulf %73, %73 : vector<32x128xf32>
    %cst_36 = arith.constant dense<0.000000e+00> : vector<128xf32>
    %75 = vector.multi_reduction <add>, %74, %cst_36 [0] : vector<32x128xf32> to vector<128xf32>
    %76 = vector.shape_cast %75 : vector<128xf32> to vector<1x128xf32>
    %cst_37 = arith.constant 3.200000e+01 : f32
    %77 = vector.broadcast %cst_37 : f32 to vector<1x128xf32>
    %78 = arith.divf %76, %77 : vector<1x128xf32>
    %79 = vector.broadcast %71 : vector<1x128xf32> to vector<32x128xf32>
    %80 = arith.subf %67, %79 : vector<32x128xf32>
    %cst_38 = arith.constant 9.99999974E-6 : f32
    %81 = vector.broadcast %cst_38 : f32 to vector<1x128xf32>
    %82 = arith.addf %78, %81 : vector<1x128xf32>
    %83 = math.rsqrt %82 : vector<1x128xf32>
    %84 = vector.broadcast %83 : vector<1x128xf32> to vector<32x128xf32>
    %85 = arith.mulf %80, %84 : vector<32x128xf32>
    %86 = vector.broadcast %49 : vector<32x1xf32> to vector<32x128xf32>
    %87 = arith.mulf %85, %86 : vector<32x128xf32>
    %88 = vector.broadcast %50 : vector<32x1xf32> to vector<32x128xf32>
    %89 = arith.addf %87, %88 : vector<32x128xf32>
    %cst_39 = arith.constant 0.000000e+00 : f32
    %90 = vector.broadcast %cst_39 : f32 to vector<32x128xf32>
    %91 = arith.maximumf %89, %90 : vector<32x128xf32>
    %c0_40 = arith.constant 0 : index
    %c0_41 = arith.constant 0 : index
    %92 = vector.load %arg10[%c0_40, %c0_41] : memref<32x1xf32, #tpu.memory_space<vmem>>, vector<32x1xf32>
    %93 = vector.broadcast %92 : vector<32x1xf32> to vector<32x128xf32>
    %94 = arith.mulf %91, %93 : vector<32x128xf32>
    %cst_42 = arith.constant dense<0.000000e+00> : vector<128xf32>
    %95 = vector.multi_reduction <add>, %94, %cst_42 [0] : vector<32x128xf32> to vector<128xf32>
    %96 = vector.shape_cast %95 : vector<128xf32> to vector<1x128xf32>
    %c0_43 = arith.constant 0 : index
    %c0_44 = arith.constant 0 : index
    %97 = vector.load %arg11[%c0_43, %c0_44] : memref<1x1xf32, #tpu.memory_space<vmem>>, vector<1x1xf32>
    %98 = vector.broadcast %97 : vector<1x1xf32> to vector<1x128xf32>
    %99 = arith.addf %96, %98 : vector<1x128xf32>
    %cst_45 = arith.constant 0.000000e+00 : f32
    %100 = vector.broadcast %cst_45 : f32 to vector<1x128xf32>
    %101 = arith.maximumf %99, %100 : vector<1x128xf32>
    %cst_46 = arith.constant 5.000000e-01 : f32
    %102 = vector.broadcast %cst_46 : f32 to vector<1x128xf32>
    %103 = arith.addf %101, %102 : vector<1x128xf32>
    %cst_47 = arith.constant 1.000000e+00 : f32
    %104 = vector.broadcast %cst_47 : f32 to vector<1x128xf32>
    %105 = arith.mulf %103, %104 : vector<1x128xf32>
    %106 = arith.fptosi %105 : vector<1x128xf32> to vector<1x128xi32>
    %107 = tpu.iota {dimensions = array<i32: 1>} : vector<1x128xi32>
    %c1_i32_48 = arith.constant 1 : i32
    %108 = vector.broadcast %c1_i32_48 : i32 to vector<1x128xi32>
    %109 = arith.cmpi sge, %107, %108 : vector<1x128xi32>
    %c1_i32_49 = arith.constant 1 : i32
    %110 = tpu.dynamic_rotate %106 by %c1_i32_49 dim 1 : vector<1x128xi32>, i32 -> vector<1x128xi32>
    %c0_i32_50 = arith.constant 0 : i32
    %111 = vector.broadcast %c0_i32_50 : i32 to vector<1x128xi32>
    %112 = arith.select %109, %110, %111 : vector<1x128xi1>, vector<1x128xi32>
    %113 = arith.addi %106, %112 : vector<1x128xi32>
    %c2_i32 = arith.constant 2 : i32
    %114 = vector.broadcast %c2_i32 : i32 to vector<1x128xi32>
    %115 = arith.cmpi sge, %107, %114 : vector<1x128xi32>
    %c2_i32_51 = arith.constant 2 : i32
    %116 = tpu.dynamic_rotate %113 by %c2_i32_51 dim 1 : vector<1x128xi32>, i32 -> vector<1x128xi32>
    %c0_i32_52 = arith.constant 0 : i32
    %117 = vector.broadcast %c0_i32_52 : i32 to vector<1x128xi32>
    %118 = arith.select %115, %116, %117 : vector<1x128xi1>, vector<1x128xi32>
    %119 = arith.addi %113, %118 : vector<1x128xi32>
    %c4_i32 = arith.constant 4 : i32
    %120 = vector.broadcast %c4_i32 : i32 to vector<1x128xi32>
    %121 = arith.cmpi sge, %107, %120 : vector<1x128xi32>
    %c4_i32_53 = arith.constant 4 : i32
    %122 = tpu.dynamic_rotate %119 by %c4_i32_53 dim 1 : vector<1x128xi32>, i32 -> vector<1x128xi32>
    %c0_i32_54 = arith.constant 0 : i32
    %123 = vector.broadcast %c0_i32_54 : i32 to vector<1x128xi32>
    %124 = arith.select %121, %122, %123 : vector<1x128xi1>, vector<1x128xi32>
    %125 = arith.addi %119, %124 : vector<1x128xi32>
    %c8_i32 = arith.constant 8 : i32
    %126 = vector.broadcast %c8_i32 : i32 to vector<1x128xi32>
    %127 = arith.cmpi sge, %107, %126 : vector<1x128xi32>
    %c8_i32_55 = arith.constant 8 : i32
    %128 = tpu.dynamic_rotate %125 by %c8_i32_55 dim 1 : vector<1x128xi32>, i32 -> vector<1x128xi32>
    %c0_i32_56 = arith.constant 0 : i32
    %129 = vector.broadcast %c0_i32_56 : i32 to vector<1x128xi32>
    %130 = arith.select %127, %128, %129 : vector<1x128xi1>, vector<1x128xi32>
    %131 = arith.addi %125, %130 : vector<1x128xi32>
    %c16_i32 = arith.constant 16 : i32
    %132 = vector.broadcast %c16_i32 : i32 to vector<1x128xi32>
    %133 = arith.cmpi sge, %107, %132 : vector<1x128xi32>
    %c16_i32_57 = arith.constant 16 : i32
    %134 = tpu.dynamic_rotate %131 by %c16_i32_57 dim 1 : vector<1x128xi32>, i32 -> vector<1x128xi32>
    %c0_i32_58 = arith.constant 0 : i32
    %135 = vector.broadcast %c0_i32_58 : i32 to vector<1x128xi32>
    %136 = arith.select %133, %134, %135 : vector<1x128xi1>, vector<1x128xi32>
    %137 = arith.addi %131, %136 : vector<1x128xi32>
    %c32_i32 = arith.constant 32 : i32
    %138 = vector.broadcast %c32_i32 : i32 to vector<1x128xi32>
    %139 = arith.cmpi sge, %107, %138 : vector<1x128xi32>
    %c32_i32_59 = arith.constant 32 : i32
    %140 = tpu.dynamic_rotate %137 by %c32_i32_59 dim 1 : vector<1x128xi32>, i32 -> vector<1x128xi32>
    %c0_i32_60 = arith.constant 0 : i32
    %141 = vector.broadcast %c0_i32_60 : i32 to vector<1x128xi32>
    %142 = arith.select %139, %140, %141 : vector<1x128xi1>, vector<1x128xi32>
    %143 = arith.addi %137, %142 : vector<1x128xi32>
    %c64_i32 = arith.constant 64 : i32
    %144 = vector.broadcast %c64_i32 : i32 to vector<1x128xi32>
    %145 = arith.cmpi sge, %107, %144 : vector<1x128xi32>
    %c64_i32_61 = arith.constant 64 : i32
    %146 = tpu.dynamic_rotate %143 by %c64_i32_61 dim 1 : vector<1x128xi32>, i32 -> vector<1x128xi32>
    %c0_i32_62 = arith.constant 0 : i32
    %147 = vector.broadcast %c0_i32_62 : i32 to vector<1x128xi32>
    %148 = arith.select %145, %146, %147 : vector<1x128xi1>, vector<1x128xi32>
    %149 = arith.addi %143, %148 : vector<1x128xi32>
    %150 = arith.subi %149, %106 : vector<1x128xi32>
    %c0_63 = arith.constant 0 : index
    %c0_64 = arith.constant 0 : index
    %c0_65 = arith.constant 0 : index
    %151 = vector.load %arg13[%c0_63, %c0_64, %c0_65] : memref<1x1x128xi32, #tpu.memory_space<vmem>>, vector<1x1x128xi32>
    %152 = vector.shape_cast %151 : vector<1x1x128xi32> to vector<1x128xi32>
    %153 = vector.shape_cast %106 : vector<1x128xi32> to vector<1x1x128xi32>
    tpu.vector_store %arg13[%c0_63, %c0_64, %c0_65], %153 {strides = array<i32>} : memref<1x1x128xi32, #tpu.memory_space<vmem>>, vector<1x1x128xi32>,
    %154 = vector.extract_strided_slice %149 {offsets = [0, 127], sizes = [1, 1], strides = [1, 1]} : vector<1x128xi32> to vector<1x1xi32>
    %c0_66 = arith.constant 0 : index
    %c0_67 = arith.constant 0 : index
    %c0_68 = arith.constant 0 : index
    %155 = vector.load %arg14[%c0_66, %c0_67, %c0_68] : memref<1x1x1xi32, #tpu.memory_space<vmem>>, vector<1x1x1xi32>
    %156 = vector.shape_cast %155 : vector<1x1x1xi32> to vector<1x1xi32>
    %157 = vector.shape_cast %154 : vector<1x1xi32> to vector<1x1x1xi32>
    tpu.vector_store %arg14[%c0_66, %c0_67, %c0_68], %157 {strides = array<i32>} : memref<1x1x1xi32, #tpu.memory_space<vmem>>, vector<1x1x1xi32>,
    %158 = tpu.iota {dimensions = array<i32: 0>} : vector<128x128xi32>
    %c0_i32_69 = arith.constant 0 : i32
    %159 = vector.broadcast %c0_i32_69 : i32 to vector<1x128xi32>
    %160 = arith.subi %150, %159 : vector<1x128xi32>
    %161 = vector.broadcast %160 : vector<1x128xi32> to vector<128x128xi32>
    %162 = arith.cmpi sge, %158, %161 : vector<128x128xi32>
    %c0_i32_70 = arith.constant 0 : i32
    %163 = vector.broadcast %c0_i32_70 : i32 to vector<1x128xi32>
    %164 = arith.subi %149, %163 : vector<1x128xi32>
    %165 = vector.broadcast %164 : vector<1x128xi32> to vector<128x128xi32>
    %166 = arith.cmpi slt, %158, %165 : vector<128x128xi32>
    %167 = arith.andi %162, %166 : vector<128x128xi1>
    %168 = arith.extui %167 : vector<128x128xi1> to vector<128x128xi32>
    %169 = arith.sitofp %168 : vector<128x128xi32> to vector<128x128xf32>
    %cst_71 = arith.constant dense<0.000000e+00> : vector<32x128xf32>
    %170 = tpu.matmul %1, %169, %cst_71 {dimension_numbers = #tpu.dot_dimension_numbers<[1], [1], [0], [0], [0, 0, 1, 0], [], []>} : vector<32x128xf32>, vector<128x128xf32>, vector<32x128xf32> -> vector<32x128xf32>
    %c0_72 = arith.constant 0 : index
    %c0_73 = arith.constant 0 : index
    %c0_74 = arith.constant 0 : index
    %171 = vector.load %arg12[%c0_72, %c0_73, %c0_74] : memref<1x32x512xf32, #tpu.memory_space<vmem>>, vector<1x32x128xf32>
    %172 = vector.shape_cast %171 : vector<1x32x128xf32> to vector<32x128xf32>
    %173 = vector.shape_cast %170 : vector<32x128xf32> to vector<1x32x128xf32>
    tpu.vector_store %arg12[%c0_72, %c0_73, %c0_74], %173 {strides = array<i32>} : memref<1x32x512xf32, #tpu.memory_space<vmem>>, vector<1x32x128xf32>,
    %c128_i32 = arith.constant 128 : i32
    %174 = vector.broadcast %c128_i32 : i32 to vector<1x128xi32>
    %175 = arith.subi %150, %174 : vector<1x128xi32>
    %176 = vector.broadcast %175 : vector<1x128xi32> to vector<128x128xi32>
    %177 = arith.cmpi sge, %158, %176 : vector<128x128xi32>
    %c128_i32_75 = arith.constant 128 : i32
    %178 = vector.broadcast %c128_i32_75 : i32 to vector<1x128xi32>
    %179 = arith.subi %149, %178 : vector<1x128xi32>
    %180 = vector.broadcast %179 : vector<1x128xi32> to vector<128x128xi32>
    %181 = arith.cmpi slt, %158, %180 : vector<128x128xi32>
    %182 = arith.andi %177, %181 : vector<128x128xi1>
    %183 = arith.extui %182 : vector<128x128xi1> to vector<128x128xi32>
    %184 = arith.sitofp %183 : vector<128x128xi32> to vector<128x128xf32>
    %cst_76 = arith.constant dense<0.000000e+00> : vector<32x128xf32>
    %185 = tpu.matmul %1, %184, %cst_76 {dimension_numbers = #tpu.dot_dimension_numbers<[1], [1], [0], [0], [0, 0, 1, 0], [], []>} : vector<32x128xf32>, vector<128x128xf32>, vector<32x128xf32> -> vector<32x128xf32>
    %c0_77 = arith.constant 0 : index
    %c0_78 = arith.constant 0 : index
    %c128 = arith.constant 128 : index
    %186 = vector.load %arg12[%c0_77, %c0_78, %c128] : memref<1x32x512xf32, #tpu.memory_space<vmem>>, vector<1x32x128xf32>
    %187 = vector.shape_cast %186 : vector<1x32x128xf32> to vector<32x128xf32>
    %188 = vector.shape_cast %185 : vector<32x128xf32> to vector<1x32x128xf32>
    tpu.vector_store %arg12[%c0_77, %c0_78, %c128], %188 {strides = array<i32>} : memref<1x32x512xf32, #tpu.memory_space<vmem>>, vector<1x32x128xf32>,
    %c256_i32 = arith.constant 256 : i32
    %189 = vector.broadcast %c256_i32 : i32 to vector<1x128xi32>
    %190 = arith.subi %150, %189 : vector<1x128xi32>
    %191 = vector.broadcast %190 : vector<1x128xi32> to vector<128x128xi32>
    %192 = arith.cmpi sge, %158, %191 : vector<128x128xi32>
    %c256_i32_79 = arith.constant 256 : i32
    %193 = vector.broadcast %c256_i32_79 : i32 to vector<1x128xi32>
    %194 = arith.subi %149, %193 : vector<1x128xi32>
    %195 = vector.broadcast %194 : vector<1x128xi32> to vector<128x128xi32>
    %196 = arith.cmpi slt, %158, %195 : vector<128x128xi32>
    %197 = arith.andi %192, %196 : vector<128x128xi1>
    %198 = arith.extui %197 : vector<128x128xi1> to vector<128x128xi32>
    %199 = arith.sitofp %198 : vector<128x128xi32> to vector<128x128xf32>
    %cst_80 = arith.constant dense<0.000000e+00> : vector<32x128xf32>
    %200 = tpu.matmul %1, %199, %cst_80 {dimension_numbers = #tpu.dot_dimension_numbers<[1], [1], [0], [0], [0, 0, 1, 0], [], []>} : vector<32x128xf32>, vector<128x128xf32>, vector<32x128xf32> -> vector<32x128xf32>
    %c0_81 = arith.constant 0 : index
    %c0_82 = arith.constant 0 : index
    %c256 = arith.constant 256 : index
    %201 = vector.load %arg12[%c0_81, %c0_82, %c256] : memref<1x32x512xf32, #tpu.memory_space<vmem>>, vector<1x32x128xf32>
    %202 = vector.shape_cast %201 : vector<1x32x128xf32> to vector<32x128xf32>
    %203 = vector.shape_cast %200 : vector<32x128xf32> to vector<1x32x128xf32>
    tpu.vector_store %arg12[%c0_81, %c0_82, %c256], %203 {strides = array<i32>} : memref<1x32x512xf32, #tpu.memory_space<vmem>>, vector<1x32x128xf32>,
    %c384_i32 = arith.constant 384 : i32
    %204 = vector.broadcast %c384_i32 : i32 to vector<1x128xi32>
    %205 = arith.subi %150, %204 : vector<1x128xi32>
    %206 = vector.broadcast %205 : vector<1x128xi32> to vector<128x128xi32>
    %207 = arith.cmpi sge, %158, %206 : vector<128x128xi32>
    %c384_i32_83 = arith.constant 384 : i32
    %208 = vector.broadcast %c384_i32_83 : i32 to vector<1x128xi32>
    %209 = arith.subi %149, %208 : vector<1x128xi32>
    %210 = vector.broadcast %209 : vector<1x128xi32> to vector<128x128xi32>
    %211 = arith.cmpi slt, %158, %210 : vector<128x128xi32>
    %212 = arith.andi %207, %211 : vector<128x128xi1>
    %213 = arith.extui %212 : vector<128x128xi1> to vector<128x128xi32>
    %214 = arith.sitofp %213 : vector<128x128xi32> to vector<128x128xf32>
    %cst_84 = arith.constant dense<0.000000e+00> : vector<32x128xf32>
    %215 = tpu.matmul %1, %214, %cst_84 {dimension_numbers = #tpu.dot_dimension_numbers<[1], [1], [0], [0], [0, 0, 1, 0], [], []>} : vector<32x128xf32>, vector<128x128xf32>, vector<32x128xf32> -> vector<32x128xf32>
    %c0_85 = arith.constant 0 : index
    %c0_86 = arith.constant 0 : index
    %c384 = arith.constant 384 : index
    %216 = vector.load %arg12[%c0_85, %c0_86, %c384] : memref<1x32x512xf32, #tpu.memory_space<vmem>>, vector<1x32x128xf32>
    %217 = vector.shape_cast %216 : vector<1x32x128xf32> to vector<32x128xf32>
    %218 = vector.shape_cast %215 : vector<32x128xf32> to vector<1x32x128xf32>
    tpu.vector_store %arg12[%c0_85, %c0_86, %c384], %218 {strides = array<i32>} : memref<1x32x512xf32, #tpu.memory_space<vmem>>, vector<1x32x128xf32>,
    return
  }
  func.func @transform_0(%arg0: i32) -> (i32, i32, i32) {
    %c0_i32 = arith.constant 0 : i32
    %c0_i32_0 = arith.constant 0 : i32
    %c0_i32_1 = arith.constant 0 : i32
    return %arg0, %c0_i32, %c0_i32_0 : i32, i32, i32
  }
  func.func @transform_1(%arg0: i32) -> (i32, i32) {
    %c0_i32 = arith.constant 0 : i32
    %c0_i32_0 = arith.constant 0 : i32
    %c0_i32_1 = arith.constant 0 : i32
    return %c0_i32, %c0_i32_0 : i32, i32
  }
  func.func @transform_2(%arg0: i32) -> (i32, i32) {
    %c0_i32 = arith.constant 0 : i32
    %c0_i32_0 = arith.constant 0 : i32
    %c0_i32_1 = arith.constant 0 : i32
    return %c0_i32, %c0_i32_0 : i32, i32
  }
  func.func @transform_3(%arg0: i32) -> (i32, i32) {
    %c0_i32 = arith.constant 0 : i32
    %c0_i32_0 = arith.constant 0 : i32
    %c0_i32_1 = arith.constant 0 : i32
    return %c0_i32, %c0_i32_0 : i32, i32
  }
  func.func @transform_4(%arg0: i32) -> (i32, i32) {
    %c0_i32 = arith.constant 0 : i32
    %c0_i32_0 = arith.constant 0 : i32
    %c0_i32_1 = arith.constant 0 : i32
    return %c0_i32, %c0_i32_0 : i32, i32
  }
  func.func @transform_5(%arg0: i32) -> (i32, i32) {
    %c0_i32 = arith.constant 0 : i32
    %c0_i32_0 = arith.constant 0 : i32
    %c0_i32_1 = arith.constant 0 : i32
    return %c0_i32, %c0_i32_0 : i32, i32
  }
  func.func @transform_6(%arg0: i32) -> (i32, i32) {
    %c0_i32 = arith.constant 0 : i32
    %c0_i32_0 = arith.constant 0 : i32
    %c0_i32_1 = arith.constant 0 : i32
    return %c0_i32, %c0_i32_0 : i32, i32
  }
  func.func @transform_7(%arg0: i32) -> (i32, i32) {
    %c0_i32 = arith.constant 0 : i32
    %c0_i32_0 = arith.constant 0 : i32
    %c0_i32_1 = arith.constant 0 : i32
    return %c0_i32, %c0_i32_0 : i32, i32
  }
  func.func @transform_8(%arg0: i32) -> (i32, i32) {
    %c0_i32 = arith.constant 0 : i32
    %c0_i32_0 = arith.constant 0 : i32
    %c0_i32_1 = arith.constant 0 : i32
    return %c0_i32, %c0_i32_0 : i32, i32
  }
  func.func @transform_9(%arg0: i32) -> (i32, i32) {
    %c0_i32 = arith.constant 0 : i32
    %c0_i32_0 = arith.constant 0 : i32
    %c0_i32_1 = arith.constant 0 : i32
    return %c0_i32, %c0_i32_0 : i32, i32
  }
  func.func @transform_10(%arg0: i32) -> (i32, i32) {
    %c0_i32 = arith.constant 0 : i32
    %c0_i32_0 = arith.constant 0 : i32
    %c0_i32_1 = arith.constant 0 : i32
    return %c0_i32, %c0_i32_0 : i32, i32
  }
  func.func @transform_11(%arg0: i32) -> (i32, i32, i32) {
    %c0_i32 = arith.constant 0 : i32
    %c0_i32_0 = arith.constant 0 : i32
    %c0_i32_1 = arith.constant 0 : i32
    return %arg0, %c0_i32, %c0_i32_0 : i32, i32, i32
  }
  func.func @transform_12(%arg0: i32) -> (i32, i32, i32) {
    %c0_i32 = arith.constant 0 : i32
    %c0_i32_0 = arith.constant 0 : i32
    %c0_i32_1 = arith.constant 0 : i32
    return %arg0, %c0_i32, %c0_i32_0 : i32, i32, i32
  }
  func.func @transform_13(%arg0: i32) -> (i32, i32, i32) {
    %c0_i32 = arith.constant 0 : i32
    %c0_i32_0 = arith.constant 0 : i32
    %c0_i32_1 = arith.constant 0 : i32
    return %arg0, %c0_i32, %c0_i32_0 : i32, i32, i32
  }
}

</mosaic_0001>

<bundles_post_ra>
// kernel: length_regulator_forward.1
= control target key start
LH: loop header
LB: loop body
LE: loop exit
PB: predicated region body
PF: predicated region fallthrough
CT: control target
= control target key end

     0   :  { %s4252_s0 = inlined_call_operand.vmem [shape: f32[2,32,128], index: 0, kind: input, shape index: {}]   ;;  %s4253_s1 = inlined_call_operand.vmem [shape: f32[32,96], index: 1, kind: input, shape index: {}]   ;;  %s4254_s2 = inlined_call_operand.vmem [shape: f32[32,1], index: 2, kind: input, shape index: {}]   ;;  %s4255_s3 = inlined_call_operand.vmem [shape: f32[32,1], index: 3, kind: input, shape index: {}]   ;;  %s4256_s4 = inlined_call_operand.vmem [shape: f32[32,1], index: 4, kind: input, shape index: {}]   ;;  %s4257_s5 = inlined_call_operand.vmem [shape: f32[32,96], index: 5, kind: input, shape index: {}]   ;;  %s4258_s6 = inlined_call_operand.vmem [shape: f32[32,1], index: 6, kind: input, shape index: {}]   ;;  %s4259_s7 = inlined_call_operand.vmem [shape: f32[32,1], index: 7, kind: input, shape index: {}]   ;;  %s4260_s8 = inlined_call_operand.vmem [shape: f32[32,1], index: 8, kind: input, shape index: {}]   ;;  %s4261_s9 = inlined_call_operand.vmem [shape: f32[32,1], index: 9, kind: input, shape index: {}]   ;;  %s4262_s10 = inlined_call_operand.<no memory space> [shape: f32[1,1], index: 10, kind: input, shape index: {}]   ;;  %s4263_s11 = inlined_call_operand.hbm [shape: f32[2,32,512], index: 11, kind: output, shape index: {0}]   ;;  %s4264_s12 = inlined_call_operand.hbm [shape: s32[2,1,128], index: 12, kind: output, shape index: {1}]   ;;  %s4265_s13 = inlined_call_operand.vmem [shape: s32[2,1,1], index: 13, kind: output, shape index: {2}]  }
   0x1   :  { %4332 = sst [smem:[#allocation11_spill]] %s4252_s0  ;;  %v19_v0 = vstv %s4262_s10 }
   0x2   :  { %4333 = sst [smem:[#allocation12_spill]] %s4253_s1  ;;  %20 = vst [vmem:[#allocation2] sm:$0x1] %v19_v0 }
   0x3   :  { %21 = vsyncpa [#allocation4], 0 }
   0x4   :  { %23 = vsyncpa [#allocation4 + $0x1], 0 }
   0x5   :  { %24 = vsyncpa [#allocation6], 0 }
   0x6   :  { %26 = vsyncpa [#allocation6 + $0x1], 0  ;;  %s2749_s27 = smov 0   ;;  %s2751_s28 = smov 0  }
   0x7   :  { %s2753_s29 = smov 0   ;;  %s2755_s30 = smov 0  }
   0x8 LB: > { %4334 = sst [smem:[#allocation9_spill]] %s2657_s29  ;;  %s2770_s10 = sadd.s32 4294967295, %s2661_s30   ;;  %s2661_s30 = sphi %s2755_s30, %s4558_s30   ;;  %s2657_s29 = sphi %s2753_s29, %s4555_s29   ;;  %s2653_s28 = sphi %s2751_s28, %s4557_s28   ;;  %s2649_s27 = sphi %s2749_s27, %s4556_s27  }
   0x9   : > { %s1857_s14 = sadd.s32 4294967294, %s2661_s30   ;;  %s2774_s15 = sadd.s32 1, %s2661_s30  }
   0xa   : > { %s275_s16 = sadd.s32 1, %s2657_s29  ;;  %s272_s17 = ssub.s32 %s2661_s30, %s2774_s15 }
   0xb   : > { %p285_p0 = scmp.ne.s32.totalorder %s2657_s29, %s2653_s28  ;;  %p273_p1 = scmp.eq.s32.totalorder %s272_s17, 0 }
   0xc   : > { %p286_p2 = scmp.eq.s32.totalorder %s2770_s10, 1  ;;  %p291_p3 = scmp.ne.s32.totalorder %s2653_s28, %s2649_s27 }
   0xd   : > { %p292_p4 = scmp.eq.s32.totalorder %s1857_s14, 1  ;;  %p1860_p7 = scmp.ge.s32.totalorder %s2661_s30, 1 }
   0xe   : > { %s2785_s18 = scalar_select %p273_p1, %s2657_s29, %s275_s16  }
   0xf   : > { %p2787_p5 = por %p286_p2, %p285_p0  ;;  %p2791_p6 = por %p292_p4, %p291_p3 }
  0x10   : > { %4335 = sst [smem:[#allocation10_spill]] %s2785_s18  ;;  %p400_p8 = scmp.lt.s32.totalorder %s2661_s30, 3 }
  0x12   : > { %p401_p9 = pnand %p1860_p7, %p400_p8 }
  0x13   : > { %p451_p10 = scmp.lt.s32.totalorder (!%p401_p9), %s2770_s10, 1  ;;  %s4338_s0 = sld [smem:[#allocation11_spill]] (!%p401_p9)  ;;  %vm536_vm0 = vcmask (!%p401_p9), 785408   ;;  %v469_v10 = vld [vmem:[%s4254_s2 + $0x8] sm:$0xff] (!%p401_p9)  ;;  %v468_v11 = vld [vmem:[%s4254_s2] sm:$0xff] (!%p401_p9)  ;;  %v2665_v12 = vmov (!%p401_p9), 0   ;;  %v480_v23 = vlaneseq (!%p401_p9) }
  0x14   : > { %404 = sbr.rel (%p401_p9) target bundleno = 2125 (0x84d), region = 64  ;;  %s4266_s26 = smov (!%p401_p9), 1   ;;  %2538 = vset.pattern.permute.xlu1 (!%p401_p9), %v2665_v12  ;;  %2537 = vset.pattern.permute.xlu0 (!%p401_p9), %v2665_v12  ;;  %v470_v13 = vld [vmem:[%s4254_s2 + $0x10] sm:$0xff] (!%p401_p9)  ;;  %v471_v14 = vld [vmem:[%s4254_s2 + $0x18] sm:$0xff] (!%p401_p9)  ;;  %v472_v15 = vld [vmem:[%s4255_s3] sm:$0xff] (!%p401_p9) }
  0x15   : > { %s4268_s14 = smov (!%p401_p9), 127   ;;  %s4339_s1 = sld [smem:[#allocation12_spill]] (!%p401_p9)  ;;  %v473_v16 = vld [vmem:[%s4255_s3 + $0x8] sm:$0xff] (!%p401_p9)  ;;  %v476_v17 = vld [vmem:[%s4256_s4] sm:$0xff] (!%p401_p9)  ;;  %v474_v19 = vld [vmem:[%s4255_s3 + $0x10] sm:$0xff] (!%p401_p9)  ;;  %v2865_v24 = vand.u32 (!%p401_p9), 127, %v480_v23 }
  0x16   : > { %v477_v18 = vld [vmem:[%s4256_s4 + $0x8] sm:$0xff] (!%p401_p9)  ;;  %v475_v20 = vld [vmem:[%s4255_s3 + $0x18] sm:$0xff] (!%p401_p9)  ;;  %v478_v21 = vld [vmem:[%s4256_s4 + $0x10] sm:$0xff] (!%p401_p9)  ;;  %s4345_s24 = smov (!%p401_p9), 127   ;;  %s2998_s18 = sand.u32 (!%p401_p9), 1, %s2653_s28  }
  0x17   : > { %v479_v22 = vld [vmem:[%s4256_s4 + $0x18] sm:$0xff] (!%p401_p9)  ;;  %vm2050_vm1 = vcmp.ne.s32.totalorder (!%p401_p9), %v2865_v24, 0  ;;  %vm2051_vm3 = vcmp.ne.s32.totalorder (!%p401_p9), %v2865_v24, 127  ;;  %v681_v28 = vld [vmem:[%s4257_s5 + $0x10] sm:$0xff] (!%p401_p9)  ;;  %vm939_vm5 = vcmp.ge.s32.totalorder (!%p401_p9), %v2865_v24, 1  ;;  %s2666_s29 = smov (!%p401_p9), 2  }
  0x18   : > { %vm2868_vm2 = vmpackc.low (!%p401_p9), %vm2050_vm1, %vm2050_vm1  ;;  %vm944_vm6 = vcmp.ge.s32.totalorder (!%p401_p9), %v2865_v24, 2  ;;  %vm949_vm7 = vcmp.ge.s32.totalorder (!%p401_p9), %v2865_v24, 4  ;;  %s2668_s16 = smov (!%p401_p9), 8   ;;  %vm954_vm8 = vcmp.ge.s32.totalorder (!%p401_p9), %v2865_v24, 8  ;;  %s2669_s17 = smov (!%p401_p9), 16   ;;  %vm959_vm9 = vcmp.ge.s32.totalorder (!%p401_p9), %v2865_v24, 16 }
  0x19   : > { %vm2883_vm4 = vmpackc.low (!%p401_p9), %vm2051_vm3, %vm2051_vm3  ;;  %vm964_vm10 = vcmp.ge.s32.totalorder (!%p401_p9), %v2865_v24, 32  ;;  %vm969_vm11 = vcmp.ge.s32.totalorder (!%p401_p9), %v2865_v24, 64 }
  0x1b   : > { %s2799_s21 = scalar_select %p451_p10, %s2770_s10, 1  ;;  %v464_v7 = vld [vmem:[%s4339_s1] sm:$0xff]  ;;  %v465_v8 = vld [vmem:[%s4339_s1 + $0x8] sm:$0xff]  ;;  %v466_v45 = vld [vmem:[%s4339_s1 + $0x10] sm:$0xff] }
  0x1c   : > { %v508_v9 = vpack.c.bf16 %v465_v8, %v464_v7  ;;  %v467_v46 = vld [vmem:[%s4339_s1 + $0x18] sm:$0xff]  ;;  %s2671_s1 = smov 64  }
  0x1d   : > { %s2048_s22 = sshll.u32 %s2799_s21, 5  ;;  %v509_v47 = vpack.c.bf16 %v467_v46, %v466_v45  ;;  %s458_s23 = scalar_lea.vmem %s4265_s13, %s2799_s21 }
  0x1e   : > { %s2805_s25 = scalar_lea.vmem %s4338_s0, %s2048_s22  ;;  %2160 = vmatprep.mubr.msk.bf16.mxu0 %vm536_vm0, %v508_v9  ;;  %s4344_s0 = smov 1  }
  0x1f   : > { %v2808_v1 = vld [vmem:[%s2805_s25] sm:$0xff]  ;;  %v461_v2 = vld [vmem:[%s2805_s25 + $0x8] sm:$0xff]  ;;  %v2812_v3 = vld [vmem:[%s2805_s25 + $0x10] sm:$0xff]  ;;  %s2670_s22 = smov 32   ;;  %s2045_s21 = sshll.u32 %s2770_s10, 4 }
  0x20   : > { %v2517_v4 = vpack.i.bf16 %v461_v2, %v2808_v1  ;;  %v463_v5 = vld [vmem:[%s2805_s25 + $0x18] sm:$0xff]  ;;  %v512_v35 = vpack.c.bf16 %v461_v2, %v2808_v1 }
  0x21   : > { %v2522_v6 = vpack.i.bf16 %v463_v5, %v2812_v3  ;;  %v513_v38 = vpack.c.bf16 %v463_v5, %v2812_v3 }
  0x22   : > { %2518 = vrot.lane.b32.xlu0 %v2517_v4, %s4266_s26  ;;  %2528 = vrot.lane.b32.xlu1 %v2517_v4, %s4268_s14 }
  0x26   : > { %2523 = vrot.lane.b32.xlu0 %v2522_v6, %s4266_s26  ;;  %2533 = vrot.lane.b32.xlu1 %v2522_v6, %s4268_s14  ;;  %s445_s26 = scalar_lea.vmem [#allocation5], %s2998_s18  ;;  %s2667_s14 = smov 4  }
  0x2a   : > { %523 = vperm.xlu1 %2538, %v469_v10   ;;  %518 = vperm.xlu0 %2537, %v468_v11  }
  0x2e   : > { %528 = vperm.xlu1 %2538, %v470_v13   ;;  %533 = vperm.xlu0 %2537, %v471_v14  }
  0x32   : > { %629 = vperm.xlu1 %2538, %v472_v15   ;;  %634 = vperm.xlu0 %2537, %v473_v16  }
  0x36   : > { %653 = vperm.xlu1 %2538, %v476_v17   ;;  %658 = vperm.xlu0 %2537, %v477_v18  }
  0x3a   : > { %639 = vperm.xlu1 %2538, %v474_v19   ;;  %644 = vperm.xlu0 %2537, %v475_v20  }
  0x3e   : > { %663 = vperm.xlu1 %2538, %v478_v21   ;;  %668 = vperm.xlu0 %2537, %v479_v22  }
  0x94   : > { %v2519_v25 = vpop.permute.xlu0 %2518  ;;  %v2529_v33 = vpop.permute.xlu1 %2528 }
  0x95   : > { %v2521_v26 = vunpack.i.h.bf16 %v2519_v25  ;;  %v2520_v27 = vunpack.i.l.bf16 %v2519_v25  ;;  %v2531_v36 = vunpack.i.h.bf16 %v2529_v33  ;;  %v2530_v37 = vunpack.i.l.bf16 %v2529_v33 }
  0x97   : > { %v1867_v29 = vpack.c.bf16 %v2521_v26, %v2520_v27  ;;  %v1877_v40 = vpack.c.bf16 %v2531_v36, %v2530_v37 }
  0x98   : > { %v2524_v30 = vpop.permute.xlu0 %2523  ;;  %v2534_v39 = vpop.permute.xlu1 %2533 }
  0x99   : > { %v2526_v31 = vunpack.i.h.bf16 %v2524_v30  ;;  %v2525_v32 = vunpack.i.l.bf16 %v2524_v30  ;;  %2148 = vmatprep.subr.msk.bf16.mxu0 %vm2868_vm2, %v1867_v29  ;;  %v2536_v41 = vunpack.i.h.bf16 %v2534_v39  ;;  %v2535_v42 = vunpack.i.l.bf16 %v2534_v39 }
  0x9a   : > { %2149 = vmatpush3.bf16.msk.msra.mxu0 %vm2868_vm2, %v1867_v29 }
  0x9b   : > { %v1872_v34 = vpack.c.bf16 %v2526_v31, %v2525_v32  ;;  %v1882_v44 = vpack.c.bf16 %v2536_v41, %v2535_v42 }
  0x9d   : > { %2150 = vmatprep.subr.msk.bf16.mxu0 %vm2868_vm2, %v1872_v34 }
  0x9e   : > { %2151 = vmatpush3.bf16.msk.msra.mxu0 %vm2868_vm2, %v1872_v34 }
  0x9f   : > { %2152 = vmatprep.subr.bf16.mxu0 %v512_v35 }
  0xa2   : > { %2153 = vmatpush3.bf16.msra.mxu0 %v512_v35 }
  0xa3   : > { %2154 = vmatprep.subr.bf16.mxu0 %v513_v38 }
  0xa6   : > { %2155 = vmatpush3.bf16.msra.mxu0 %v513_v38 }
  0xa7   : > { %2156 = vmatprep.subr.msk.bf16.mxu0 %vm2883_vm4, %v1877_v40 }
  0xa9   : > { %v524_v48 = vpop.permute.xlu1 %523  ;;  %v519_v50 = vpop.permute.xlu0 %518 }
  0xaa   : > { %2157 = vmatpush3.bf16.msk.msra.mxu0 %vm2883_vm4, %v1877_v40 }
  0xab   : > { %2158 = vmatprep.subr.msk.bf16.mxu0 %vm2883_vm4, %v1882_v44 }
  0xad   : > { %v529_v56 = vpop.permute.xlu1 %528  ;;  %v534_v59 = vpop.permute.xlu0 %533 }
  0xae   : > { %2159 = vmatpush3.bf16.msk.msra.mxu0 %vm2883_vm4, %v1882_v44 }
  0xb1   : > { %2161 = vmatmul.mubr.msk.bf16.vlgmr.msra.gmra.mrb[0].mxu0 %vm536_vm0, %v509_v47  ;;  %v630_v26 = vpop.permute.xlu1 %629  ;;  %v635_v27 = vpop.permute.xlu0 %634 }
  0xb2   : > { %2212 = vmatprep.mubr.f32.mxu0 %v2808_v1 }
  0xb5   : > { %v654_v31 = vpop.permute.xlu1 %653  ;;  %v659_v32 = vpop.permute.xlu0 %658 }
  0xb9   : > { %v640_v33 = vpop.permute.xlu1 %639  ;;  %v645_v34 = vpop.permute.xlu0 %644 }
  0xbd   : > { %v664_v45 = vpop.permute.xlu1 %663  ;;  %v669_v46 = vpop.permute.xlu0 %668 }
 0x184   : > { %v2162_v49 = vpop.f32.mrb[0].mxu0 }
 0x185   : > { %v577_v51 = vpop.f32.mrb[1].mxu0  ;;  %v586_v57 = vadd.f32 %v2162_v49, %v529_v56 }
 0x186   : > { %v2163_v52 = vpop.f32.mrb[2].mxu0  ;;  %v578_v54 = vadd.f32 %v577_v51, %v519_v50 }
 0x187   : > { %v580_v53 = vpop.f32.mrb[3].mxu0  ;;  %v589_v60 = vadd.f32 %v2163_v52, %v534_v59  ;;  %v684_v59 = vld [vmem:[%s4258_s6 + $0x8] sm:$0xff] }
 0x188   : > { %v581_v55 = vadd.f32 %v580_v53, %v524_v48 }
 0x18a   : > { %v592_v58 = vadd.f32 %v581_v55, %v578_v54 }
 0x18c   : > { %v593_v61 = vadd.f32 %v592_v58, %v586_v57 }
 0x18e   : > { %v594_v62 = vadd.f32 %v593_v61, %v589_v60  ;;  %v686_v61 = vld [vmem:[%s4258_s6 + $0x18] sm:$0xff] }
 0x190   : > { %v595_v63 = vrot.slane %v594_v62, 4 }
 0x192   : > { %v596_v0 = vadd.f32 %v595_v63, %v594_v62  ;;  %v685_v62 = vld [vmem:[%s4258_s6 + $0x10] sm:$0xff]  ;;  %v679_v63 = vld [vmem:[%s4257_s5] sm:$0xff] }
 0x194   : > { %v597_v2 = vrot.slane %v596_v0, 2 }
 0x196   : > { %v598_v3 = vadd.f32 %v597_v2, %v596_v0  ;;  %v680_v0 = vld [vmem:[%s4257_s5 + $0x8] sm:$0xff] }
 0x197   : > { %v688_v2 = vld [vmem:[%s4259_s7 + $0x8] sm:$0xff] }
 0x198   : > { %v599_v4 = vrot.slane %v598_v3, 1 }
 0x19a   : > { %v600_v5 = vadd.f32 %v599_v4, %v598_v3  ;;  %v687_v3 = vld [vmem:[%s4259_s7] sm:$0xff]  ;;  %v719_v4 = vpack.c.bf16 %v680_v0, %v679_v63 }
 0x19c   : > { %v602_v6 = vmul.f32 0.03125, %v600_v5  ;;  %2176 = vmatprep.mubr.msk.bf16.mxu1 %vm536_vm0, %v719_v4  ;;  %v691_v5 = vld [vmem:[%s4260_s8] sm:$0xff] }
 0x19e   : > { %v603_v7 = vsub.f32 %v578_v54, %v602_v6  ;;  %v604_v8 = vsub.f32 %v581_v55, %v602_v6  ;;  %v605_v9 = vsub.f32 %v586_v57, %v602_v6  ;;  %v606_v10 = vsub.f32 %v589_v60, %v602_v6  ;;  %v683_v60 = vld [vmem:[%s4258_s6] sm:$0xff]  ;;  %v689_v6 = vld [vmem:[%s4259_s7 + $0x10] sm:$0xff] }
 0x1a0   : > { %v607_v11 = vmul.f32 %v603_v7, %v603_v7  ;;  %v608_v12 = vmul.f32 %v604_v8, %v604_v8  ;;  %v609_v13 = vmul.f32 %v605_v9, %v605_v9  ;;  %v610_v15 = vmul.f32 %v606_v10, %v606_v10 }
 0x1a2   : > { %v611_v14 = vadd.f32 %v608_v12, %v607_v11  ;;  %v889_v11 = vld [vmem:[%s4261_s9 + $0x8] sm:$0xff]  ;;  %v888_v12 = vld [vmem:[%s4261_s9] sm:$0xff] }
 0x1a4   : > { %v612_v16 = vadd.f32 %v611_v14, %v609_v13  ;;  %v891_v13 = vld [vmem:[%s4261_s9 + $0x18] sm:$0xff]  ;;  %v890_v14 = vld [vmem:[%s4261_s9 + $0x10] sm:$0xff] }
 0x1a6   : > { %v613_v17 = vadd.f32 %v612_v16, %v610_v15  ;;  %v925_v15 = vld [vmem:[#allocation2] sm:$0x1] }
 0x1a8   : > { %v614_v18 = vrot.slane %v613_v17, 4 }
 0x1aa   : > { %v615_v19 = vadd.f32 %v614_v18, %v613_v17 }
 0x1ac   : > { %v616_v20 = vrot.slane %v615_v19, 2 }
 0x1ae   : > { %v617_v21 = vadd.f32 %v616_v20, %v615_v19 }
 0x1b0   : > { %v618_v22 = vrot.slane %v617_v21, 1 }
 0x1b2   : > { %v619_v25 = vadd.f32 %v618_v22, %v617_v21 }
 0x1b4   : > { %v620_v29 = vmul.f32 0.03125, %v619_v25 }
 0x1b6   : > { %v621_v30 = vadd.f32 1e-05, %v620_v29 }
 0x1b8   : > { %2559 = vrsqrt.f32 %v621_v30 }
 0x1c2   : > { %v2560_v35 = vpop.eup %2559 }
 0x1c3   : > { %v623_v36 = vmul.f32 %v2560_v35, %v603_v7  ;;  %v624_v37 = vmul.f32 %v2560_v35, %v604_v8  ;;  %v625_v38 = vmul.f32 %v2560_v35, %v605_v9  ;;  %v626_v39 = vmul.f32 %v2560_v35, %v606_v10  ;;  %v690_v7 = vld [vmem:[%s4259_s7 + $0x18] sm:$0xff]  ;;  %v692_v8 = vld [vmem:[%s4260_s8 + $0x8] sm:$0xff]  ;;  %v693_v10 = vld [vmem:[%s4260_s8 + $0x10] sm:$0xff] }
 0x1c4   : > { %v694_v9 = vld [vmem:[%s4260_s8 + $0x18] sm:$0xff] }
 0x1c5   : > { %v648_v40 = vmul.f32 %v635_v27, %v624_v37  ;;  %v649_v41 = vmul.f32 %v640_v33, %v625_v38  ;;  %v650_v42 = vmul.f32 %v645_v34, %v626_v39  ;;  %v647_v44 = vmul.f32 %v630_v26, %v623_v36  ;;  %v682_v35 = vld [vmem:[%s4257_s5 + $0x18] sm:$0xff] }
 0x1c6   : > { %v720_v36 = vpack.c.bf16 %v682_v35, %v681_v28 }
 0x1c7   : > { %v672_v47 = vadd.f32 %v659_v32, %v648_v40  ;;  %v673_v48 = vadd.f32 %v664_v45, %v649_v41  ;;  %v674_v49 = vadd.f32 %v669_v46, %v650_v42  ;;  %v671_v50 = vadd.f32 %v654_v31, %v647_v44 }
 0x1c9   : > { %v677_v51 = vmax.f32 %v673_v48, 0.0  ;;  %v678_v52 = vmax.f32 %v674_v49, 0.0  ;;  %v675_v53 = vmax.f32 %v671_v50, 0.0  ;;  %v676_v54 = vmax.f32 %v672_v47, 0.0 }
 0x1cb   : > { %v2544_v55 = vpack.i.bf16 %v678_v52, %v677_v51  ;;  %v2539_v56 = vpack.i.bf16 %v676_v54, %v675_v53  ;;  %v723_v57 = vpack.c.bf16 %v676_v54, %v675_v53  ;;  %v2903_v58 = vpack.c.bf16 %v678_v52, %v677_v51 }
 0x1cd   : > { %2545 = vrot.lane.b32.xlu0 %v2544_v55, %s4344_s0  ;;  %2540 = vrot.lane.b32.xlu1 %v2539_v56, %s4344_s0 }
 0x1d1   : > { %2555 = vrot.lane.b32.xlu0 %v2544_v55, %s4345_s24  ;;  %2550 = vrot.lane.b32.xlu1 %v2539_v56, %s4345_s24  ;;  %s1748_s24 = sshll.u32 %s445_s26, 4  ;;  %s1749_s24 = int_to_ptr.vmem [resolvable:$true] %s1748_s24 }
 0x1d5   : > { %734 = vperm.xlu0 %2537, %v684_v59   ;;  %729 = vperm.xlu1 %2538, %v683_v60  }
 0x1d9   : > { %744 = vperm.xlu0 %2537, %v686_v61   ;;  %739 = vperm.xlu1 %2538, %v685_v62  }
 0x1dd   : > { %843 = vperm.xlu0 %2537, %v688_v2   ;;  %838 = vperm.xlu1 %2538, %v687_v3  }
 0x1e1   : > { %862 = vperm.xlu0 %2537, %v691_v5   ;;  %848 = vperm.xlu1 %2538, %v689_v6  }
 0x1e5   : > { %853 = vperm.xlu0 %2537, %v690_v7   ;;  %867 = vperm.xlu1 %2538, %v692_v8  }
 0x1e9   : > { %877 = vperm.xlu0 %2537, %v694_v9   ;;  %872 = vperm.xlu1 %2538, %v693_v10  }
 0x1ed   : > { %899 = vperm.xlu0 %2537, %v889_v11   ;;  %894 = vperm.xlu1 %2538, %v888_v12  }
 0x1f1   : > { %909 = vperm.xlu0 %2537, %v891_v13   ;;  %904 = vperm.xlu1 %2538, %v890_v14  }
 0x1f5   : > { %928 = vperm.xlu1 %2538, %v925_v15  }
 0x23f   : > { %v2546_v16 = vpop.permute.xlu0 %2545  ;;  %v2541_v17 = vpop.permute.xlu1 %2540 }
 0x240   : > { %v2548_v18 = vunpack.i.h.bf16 %v2546_v16  ;;  %v2547_v19 = vunpack.i.l.bf16 %v2546_v16  ;;  %v2543_v20 = vunpack.i.h.bf16 %v2541_v17  ;;  %v2542_v21 = vunpack.i.l.bf16 %v2541_v17 }
 0x242   : > { %v1889_v22 = vpack.c.bf16 %v2543_v20, %v2542_v21  ;;  %v1894_v25 = vpack.c.bf16 %v2548_v18, %v2547_v19 }
 0x243   : > { %v2551_v26 = vpop.permute.xlu1 %2550  ;;  %v2556_v30 = vpop.permute.xlu0 %2555 }
 0x244   : > { %2164 = vmatprep.subr.msk.bf16.mxu1 %vm2868_vm2, %v1889_v22  ;;  %v2553_v27 = vunpack.i.h.bf16 %v2551_v26  ;;  %v2552_v29 = vunpack.i.l.bf16 %v2551_v26  ;;  %v2558_v31 = vunpack.i.h.bf16 %v2556_v30  ;;  %v2557_v32 = vunpack.i.l.bf16 %v2556_v30 }
 0x245   : > { %2165 = vmatpush3.bf16.msk.msra.mxu1 %vm2868_vm2, %v1889_v22 }
 0x246   : > { %2166 = vmatprep.subr.msk.bf16.mxu1 %vm2868_vm2, %v1894_v25  ;;  %v1899_v33 = vpack.c.bf16 %v2553_v27, %v2552_v29  ;;  %v1904_v34 = vpack.c.bf16 %v2558_v31, %v2557_v32 }
 0x249   : > { %2167 = vmatpush3.bf16.msk.msra.mxu1 %vm2868_vm2, %v1894_v25 }
 0x24a   : > { %2168 = vmatprep.subr.bf16.mxu1 %v723_v57 }
 0x24d   : > { %2169 = vmatpush3.bf16.msra.mxu1 %v723_v57 }
 0x24e   : > { %2170 = vmatprep.subr.bf16.mxu1 %v2903_v58 }
 0x251   : > { %2171 = vmatpush3.bf16.msra.mxu1 %v2903_v58 }
 0x252   : > { %2172 = vmatprep.subr.msk.bf16.mxu1 %vm2883_vm4, %v1899_v33 }
 0x254   : > { %v730_v37 = vpop.permute.xlu1 %729  ;;  %v735_v39 = vpop.permute.xlu0 %734 }
 0x255   : > { %2173 = vmatpush3.bf16.msk.msra.mxu1 %vm2883_vm4, %v1899_v33 }
 0x256   : > { %2174 = vmatprep.subr.msk.bf16.mxu1 %vm2883_vm4, %v1904_v34 }
 0x258   : > { %v740_v46 = vpop.permute.xlu1 %739  ;;  %v745_v49 = vpop.permute.xlu0 %744 }
 0x259   : > { %2175 = vmatpush3.bf16.msk.msra.mxu1 %vm2883_vm4, %v1904_v34 }
 0x25c   : > { %2177 = vmatmul.mubr.msk.bf16.vlgmr.msra.gmra.mrb[0].mxu1 %vm536_vm0, %v720_v36  ;;  %v839_v9 = vpop.permute.xlu1 %838  ;;  %v844_v11 = vpop.permute.xlu0 %843 }
 0x25d   : > { %2250 = vmatprep.mubr.f32.mxu1 %v2808_v1 }
 0x260   : > { %v849_v14 = vpop.permute.xlu1 %848  ;;  %v863_v16 = vpop.permute.xlu0 %862 }
 0x264   : > { %v868_v18 = vpop.permute.xlu1 %867  ;;  %v854_v19 = vpop.permute.xlu0 %853 }
 0x268   : > { %v873_v20 = vpop.permute.xlu1 %872  ;;  %v878_v22 = vpop.permute.xlu0 %877 }
 0x26c   : > { %v895_v34 = vpop.permute.xlu1 %894 }
 0x32f   : > { %v2178_v38 = vpop.f32.mrb[0].mxu1 }
 0x330   : > { %v787_v40 = vpop.f32.mrb[1].mxu1  ;;  %v796_v47 = vadd.f32 %v2178_v38, %v740_v46  ;;  %v900_v38 = vpop.permute.xlu0 %899 }
 0x331   : > { %v2179_v41 = vpop.f32.mrb[2].mxu1  ;;  %v788_v44 = vadd.f32 %v787_v40, %v730_v37  ;;  %v905_v46 = vpop.permute.xlu1 %904 }
 0x332   : > { %v790_v42 = vpop.f32.mrb[3].mxu1  ;;  %v799_v50 = vadd.f32 %v2179_v41, %v745_v49 }
 0x333   : > { %v791_v45 = vadd.f32 %v790_v42, %v735_v39 }
 0x334   : > { %v910_v49 = vpop.permute.xlu0 %909 }
 0x335   : > { %v802_v48 = vadd.f32 %v791_v45, %v788_v44 }
 0x337   : > { %v803_v51 = vadd.f32 %v802_v48, %v796_v47 }
 0x339   : > { %v804_v43 = vadd.f32 %v803_v51, %v799_v50 }
 0x33b   : > { %v805_v52 = vrot.slane %v804_v43, 4 }
 0x33d   : > { %v806_v53 = vadd.f32 %v805_v52, %v804_v43 }
 0x33f   : > { %v807_v54 = vrot.slane %v806_v53, 2 }
 0x341   : > { %v808_v55 = vadd.f32 %v807_v54, %v806_v53  ;;  %v2991_v53 = vshrl.u32 %v480_v23, 7 }
 0x343   : > { %v809_v1 = vrot.slane %v808_v55, 1 }
 0x345   : > { %v810_v56 = vadd.f32 %v809_v1, %v808_v55  ;;  %v2994_v1 = vsub.s32 0, %v2991_v53 }
 0x347   : > { %v811_v57 = vmul.f32 0.03125, %v810_v56 }
 0x349   : > { %v812_v58 = vsub.f32 %v788_v44, %v811_v57  ;;  %v813_v59 = vsub.f32 %v791_v45, %v811_v57  ;;  %v814_v60 = vsub.f32 %v796_v47, %v811_v57  ;;  %v815_v61 = vsub.f32 %v799_v50, %v811_v57  ;;  %v929_v57 = vpop.permute.xlu1 %928 }
 0x34b   : > { %v816_v62 = vmul.f32 %v812_v58, %v812_v58  ;;  %v817_v63 = vmul.f32 %v813_v59, %v813_v59  ;;  %v818_v0 = vmul.f32 %v814_v60, %v814_v60  ;;  %v819_v3 = vmul.f32 %v815_v61, %v815_v61 }
 0x34d   : > { %v820_v2 = vadd.f32 %v817_v63, %v816_v62 }
 0x34f   : > { %v821_v4 = vadd.f32 %v820_v2, %v818_v0 }
 0x351   : > { %v822_v5 = vadd.f32 %v821_v4, %v819_v3 }
 0x353   : > { %v823_v6 = vrot.slane %v822_v5, 4 }
 0x355   : > { %v824_v7 = vadd.f32 %v823_v6, %v822_v5 }
 0x357   : > { %v825_v8 = vrot.slane %v824_v7, 2 }
 0x359   : > { %v826_v10 = vadd.f32 %v825_v8, %v824_v7 }
 0x35b   : > { %v827_v12 = vrot.slane %v826_v10, 1 }
 0x35d   : > { %v828_v13 = vadd.f32 %v827_v12, %v826_v10 }
 0x35f   : > { %v829_v15 = vmul.f32 0.03125, %v828_v13 }
 0x361   : > { %v830_v17 = vadd.f32 1e-05, %v829_v15 }
 0x363   : > { %2561 = vrsqrt.f32 %v830_v17 }
 0x36d   : > { %v2562_v21 = vpop.eup %2561 }
 0x36e   : > { %v832_v25 = vmul.f32 %v2562_v21, %v812_v58  ;;  %v833_v26 = vmul.f32 %v2562_v21, %v813_v59  ;;  %v834_v27 = vmul.f32 %v2562_v21, %v814_v60  ;;  %v835_v29 = vmul.f32 %v2562_v21, %v815_v61 }
 0x36f   : > { %v934_v59 = vrot.slane %v929_v57, %v2994_v1  ;;  %v3277_v57 = vadd.s32 80, %v2991_v53 }
 0x370   : > { %v856_v30 = vmul.f32 %v839_v9, %v832_v25  ;;  %v857_v31 = vmul.f32 %v844_v11, %v833_v26  ;;  %v858_v32 = vmul.f32 %v849_v14, %v834_v27  ;;  %v859_v33 = vmul.f32 %v854_v19, %v835_v29 }
 0x371   : > { %v3024_v27 = vadd.s32 8, %v2991_v53 }
 0x372   : > { %v880_v28 = vadd.f32 %v863_v16, %v856_v30  ;;  %v881_v35 = vadd.f32 %v868_v18, %v857_v31  ;;  %v882_v36 = vadd.f32 %v873_v20, %v858_v32  ;;  %v883_v37 = vadd.f32 %v878_v22, %v859_v33 }
 0x373   : > { %v3033_v31 = vadd.s32 16, %v2991_v53  ;;  %v3036_v32 = vadd.s32 24, %v2991_v53 }
 0x374   : > { %v884_v39 = vmax.f32 %v880_v28, 0.0  ;;  %v885_v40 = vmax.f32 %v881_v35, 0.0  ;;  %v886_v41 = vmax.f32 %v882_v36, 0.0  ;;  %v887_v42 = vmax.f32 %v883_v37, 0.0  ;;  %v3775_v35 = vld [vmem:[%s2805_s25 + $0x10] sm:$0xff] }
 0x375   : > { %v2672_v28 = vmov 1.0|1.0   ;;  %v3093_v37 = vadd.s32 32, %v2991_v53  ;;  %v4465_v36 = vmov 0 }
 0x376   : > { %v912_v44 = vmul.f32 %v895_v34, %v884_v39  ;;  %v913_v45 = vmul.f32 %v900_v38, %v885_v40  ;;  %v914_v47 = vmul.f32 %v905_v46, %v886_v41  ;;  %v915_v50 = vmul.f32 %v910_v49, %v887_v42  ;;  %v2566_v40 = vld [vmem:[%s2805_s25] sm:$0xff] }
 0x377   : > { %v3098_v38 = vadd.s32 40, %v2991_v53  ;;  %v3153_v46 = vadd.s32 48, %v2991_v53  ;;  %v4479_v42 = vmov 0  ;;  %v4496_v49 = vmov 0 }
 0x378   : > { %v916_v48 = vadd.f32 %v913_v45, %v912_v44  ;;  %v4483_v45 = vmov 0 }
 0x37a   : > { %v917_v51 = vadd.f32 %v916_v48, %v914_v47  ;;  %v3162_v47 = vadd.s32 56, %v2991_v53  ;;  %v4492_v48 = vmov 0 }
 0x37c   : > { %v918_v43 = vadd.f32 %v917_v51, %v915_v50  ;;  %v4502_v50 = vmov 0 }
 0x37e   : > { %v919_v52 = vrot.slane %v918_v43, 4 }
 0x380   : > { %v920_v54 = vadd.f32 %v919_v52, %v918_v43  ;;  %v3217_v43 = vadd.s32 64, %v2991_v53  ;;  %v3236_v52 = vadd.s32 72, %v2991_v53 }
 0x382   : > { %v921_v55 = vrot.slane %v920_v54, 2 }
 0x384   : > { %v922_v56 = vadd.f32 %v921_v55, %v920_v54 }
 0x386   : > { %v923_v58 = vrot.slane %v922_v56, 1 }
 0x388   : > { %v924_v60 = vadd.f32 %v923_v58, %v922_v56 }
 0x38a   : > { %v935_v61 = vadd.f32 %v934_v59, %v924_v60  ;;  %v3286_v59 = vadd.s32 88, %v2991_v53  ;;  %v3305_v60 = vadd.s32 96, %v2991_v53 }
 0x38c   : > { %v936_v62 = vmax.f32 %v935_v61, 0.0  ;;  %v3308_v61 = vadd.s32 104, %v2991_v53 }
 0x38e   : > { %v937_v63 = vadd.f32 0.5, %v936_v62 }
 0x390   : > { %v2460_v23 = vtrunc.f32 %v937_v63  ;;  %v3346_v63 = vadd.s32 112, %v2991_v53 }
 0x392   : > { %v2461_v0 = vcvt.f32.s32 %v2460_v23 }
 0x394   : > { %940 = vrot.lane.b32.xlu0 %v2461_v0, %s4344_s0  ;;  %975 = vst [vmem:[%s445_s26] sm:$0x1] %v2461_v0 }
 0x406   : > { %v941_v2 = vpop.permute.xlu0 %940 }
 0x407   : > { %v942_v3 = vsel %vm939_vm5, %v941_v2, 0  ;;  %v4379_v2 = vmov 0 }
 0x408   : > { %v943_v4 = vadd.s32 %v2461_v0, %v942_v3 }
 0x40a   : > { %945 = vrot.lane.b32.xlu1 %v943_v4, %s2666_s29 }
 0x47c   : > { %v946_v5 = vpop.permute.xlu1 %945 }
 0x47d   : > { %v947_v6 = vsel %vm944_vm6, %v946_v5, 0 }
 0x47e   : > { %v948_v7 = vadd.s32 %v947_v6, %v943_v4  ;;  %v4389_v6 = vmov 0 }
 0x480   : > { %950 = vrot.lane.b32.xlu0 %v948_v7, %s2667_s14 }
 0x4f2   : > { %v951_v8 = vpop.permute.xlu0 %950 }
 0x4f3   : > { %v952_v9 = vsel %vm949_vm7, %v951_v8, 0 }
 0x4f4   : > { %v953_v10 = vadd.s32 %v952_v9, %v948_v7  ;;  %v4393_v9 = vmov 0 }
 0x4f6   : > { %955 = vrot.lane.b32.xlu1 %v953_v10, %s2668_s16  ;;  %s4162_s16 = scalar_lea.hbm %s4264_s12, %s2045_s21 }
 0x568   : > { %v956_v11 = vpop.permute.xlu1 %955 }
 0x569   : > { %v957_v12 = vsel %vm954_vm8, %v956_v11, 0 }
 0x56a   : > { %v958_v13 = vadd.s32 %v957_v12, %v953_v10  ;;  %v4395_v12 = vmov 0 }
 0x56c   : > { %960 = vrot.lane.b32.xlu0 %v958_v13, %s2669_s17  ;;  %s1717_s17 = scalar_lea.sflag [#allocation6], %s2998_s18 }
 0x5de   : > { %v961_v14 = vpop.permute.xlu0 %960 }
 0x5df   : > { %v962_v15 = vsel %vm959_vm9, %v961_v14, 0 }
 0x5e0   : > { %v963_v16 = vadd.s32 %v962_v15, %v958_v13 }
 0x5e2   : > { %965 = vrot.lane.b32.xlu1 %v963_v16, %s2670_s22 }
 0x654   : > { %v966_v17 = vpop.permute.xlu1 %965 }
 0x655   : > { %v967_v18 = vsel %vm964_vm10, %v966_v17, 0 }
 0x656   : > { %v968_v19 = vadd.s32 %v967_v18, %v963_v16  ;;  %v4400_v16 = vmov 0 }
 0x658   : > { %970 = vrot.lane.b32.xlu0 %v968_v19, %s2671_s1  ;;  %s2567_s1 = scalar_lea.vmem %s1749_s24, 16 }
 0x659   : > { %p2568_p11 = scmp.ne.s32.totalorder %s1749_s24, %s2567_s1 }
 0x65b   : > { %p2569_p12 = pnand %p2568_p11, %p2787_p5 }
 0x65d   : > { %p2570_p13 = pneg %p2569_p12 }
 0x6ca   : > { %v971_v20 = vpop.permute.xlu0 %970 }
 0x6cb   : > { %v972_v21 = vsel %vm969_vm11, %v971_v20, 0  ;;  %v4412_v20 = vmov 0 }
 0x6cc   : > { %v3012_v22 = vadd.s32 %v972_v21, %v968_v19  ;;  %v4409_v19 = vmov 0  ;;  %v4417_v21 = vmov 0 }
 0x6ce   : > { %v3015_v25 = vsub.s32 %v3012_v22, %v2461_v0  ;;  %v3019_v26 = vrot.slane %v3012_v22, %v2994_v1  ;;  %976 = vrot.lane.b32.xlu1 %v3012_v22, %s4344_s0  ;;  %v1941_v30 = vadd.s32 4294967168, %v3012_v22  ;;  %v2009_v39 = vadd.s32 4294966912, %v3012_v22 }
 0x6cf   : > { %v3364_v0 = vadd.s32 120, %v2991_v53  ;;  %v1975_v10 = vadd.s32 4294967040, %v3012_v22  ;;  %v4427_v22 = vmov 0 }
 0x6d0   : > { %v3028_v24 = vrot.slane %v3015_v25, %v2994_v1  ;;  %v1940_v29 = vadd.s32 4294967168, %v3015_v25  ;;  %vm1021_vm14 = vcmp.lt.s32.totalorder %v2991_v53, %v3019_v26  ;;  %vm1022_vm15 = vcmp.lt.s32.totalorder %v3024_v27, %v3019_v26 }
 0x6d1   : > { %v3052_v34 = vrot.slane %v1941_v30, %v2994_v1  ;;  %vm1023_vm5 = vcmp.lt.s32.totalorder %v3033_v31, %v3019_v26  ;;  %vm1024_vm6 = vcmp.lt.s32.totalorder %v3036_v32, %v3019_v26  ;;  %v3144_v44 = vrot.slane %v2009_v39, %v2994_v1 }
 0x6d2   : > { %v3039_v33 = vrot.slane %v1940_v29, %v2994_v1  ;;  %vm1001_vm12 = vcmp.ge.s32.totalorder %v2991_v53, %v3028_v24  ;;  %vm1002_vm13 = vcmp.ge.s32.totalorder %v3024_v27, %v3028_v24  ;;  %vm1003_vm1 = vcmp.ge.s32.totalorder %v3033_v31, %v3028_v24 }
 0x6d3   : > { %vm1037_vm0 = vmand %vm1001_vm12, %vm1021_vm14  ;;  %vm1004_vm3 = vcmp.ge.s32.totalorder %v3036_v32, %v3028_v24  ;;  %vm1200_vm12 = vcmp.lt.s32.totalorder %v2991_v53, %v3052_v34  ;;  %v1974_v7 = vadd.s32 4294967040, %v3015_v25  ;;  %v2008_v11 = vadd.s32 4294966912, %v3015_v25 }
 0x6d4   : > { %vm1038_vm2 = vmand %vm1002_vm13, %vm1022_vm15  ;;  %vm1179_vm8 = vcmp.ge.s32.totalorder %v2991_v53, %v3039_v33  ;;  %vm1180_vm10 = vcmp.ge.s32.totalorder %v3024_v27, %v3039_v33  ;;  %vm1201_vm13 = vcmp.lt.s32.totalorder %v3024_v27, %v3052_v34  ;;  %vm1181_vm15 = vcmp.ge.s32.totalorder %v3033_v31, %v3039_v33 }
 0x6d5   : > { %vm2332_vm4 = vmpackc.low %vm1038_vm2, %vm1037_vm0  ;;  %v3477_v13 = vrot.slane %v1974_v7, %v2994_v1  ;;  %v3506_v14 = vrot.slane %v1975_v10, %v2994_v1  ;;  %v3509_v15 = vrot.slane %v2008_v11, %v2994_v1  ;;  %v4403_v1 = vmov 0 }
 0x6d6   : > { %2333 = vmatprep.subr.msk.bf16.mxu0 %vm2332_vm4, %v2672_v28  ;;  %vm3061_vm7 = vmand %vm1003_vm1, %vm1023_vm5  ;;  %vm1182_vm1 = vcmp.ge.s32.totalorder %v3036_v32, %v3039_v33  ;;  %v4429_v25 = vmov 0  ;;  %v4448_v30 = vmov 0  ;;  %v4470_v39 = vmov 0 }
 0x6d7   : > { %2335 = vmatpush3.bf16.xpose.msk.msra.mxu0 %vm2332_vm4, %v2672_v28  ;;  %vm3068_vm9 = vmand %vm1004_vm3, %vm1024_vm6  ;;  %vm1202_vm3 = vcmp.lt.s32.totalorder %v3033_v31, %v3052_v34  ;;  %vm1203_vm4 = vcmp.lt.s32.totalorder %v3036_v32, %v3052_v34  ;;  %vm1005_vm6 = vcmp.ge.s32.totalorder %v3093_v37, %v3028_v24 }
 0x6d8   : > { %vm2336_vm11 = vmpackc.low %vm3068_vm9, %vm3061_vm7  ;;  %vm1184_vm7 = vcmp.ge.s32.totalorder %v3098_v38, %v3039_v33 }
 0x6d9   : > { %2337 = vmatprep.subr.msk.bf16.mxu0 %vm2336_vm11, %v2672_v28  ;;  %vm1216_vm14 = vmand %vm1179_vm8, %vm1200_vm12 }
 0x6da   : > { %vm1217_vm0 = vmand %vm1180_vm10, %vm1201_vm13  ;;  %vm1006_vm10 = vcmp.ge.s32.totalorder %v3098_v38, %v3028_v24  ;;  %vm1025_vm13 = vcmp.lt.s32.totalorder %v3093_v37, %v3019_v26 }
 0x6db   : > { %vm2364_vm2 = vmpackc.low %vm1217_vm0, %vm1216_vm14  ;;  %vm1026_vm14 = vcmp.lt.s32.totalorder %v3098_v38, %v3019_v26  ;;  %vm1183_vm0 = vcmp.ge.s32.totalorder %v3093_v37, %v3039_v33 }
 0x6dc   : > { %2365 = vmatprep.subr.msk.bf16.mxu1 %vm2364_vm2, %v2672_v28  ;;  %vm3104_vm5 = vmand %vm1181_vm15, %vm1202_vm3 }
 0x6dd   : > { %2367 = vmatpush3.bf16.xpose.msk.msra.mxu1 %vm2364_vm2, %v2672_v28  ;;  %vm3111_vm8 = vmand %vm1182_vm1, %vm1203_vm4  ;;  %vm1205_vm2 = vcmp.lt.s32.totalorder %v3098_v38, %v3052_v34  ;;  %vm1007_vm4 = vcmp.ge.s32.totalorder %v3153_v46, %v3028_v24 }
 0x6de   : > { %vm2368_vm12 = vmpackc.low %vm3111_vm8, %vm3104_vm5  ;;  %vm1185_vm5 = vcmp.ge.s32.totalorder %v3153_v46, %v3039_v33  ;;  %vm1010_vm8 = vcmp.ge.s32.totalorder %v3236_v52, %v3028_v24 }
 0x6df   : > { %2369 = vmatprep.subr.msk.bf16.mxu1 %vm2368_vm12, %v2672_v28  ;;  %2339 = vmatpush3.bf16.xpose.msk.msra.mxu0 %vm2336_vm11, %v2672_v28  ;;  %vm3137_vm15 = vmand %vm1005_vm6, %vm1025_vm13  ;;  %vm1204_vm11 = vcmp.lt.s32.totalorder %v3093_v37, %v3052_v34 }
 0x6e0   : > { %vm3146_vm1 = vmand %vm1006_vm10, %vm1026_vm14  ;;  %vm1008_vm10 = vcmp.ge.s32.totalorder %v3162_v47, %v3028_v24  ;;  %vm1027_vm14 = vcmp.lt.s32.totalorder %v3153_v46, %v3019_v26 }
 0x6e1   : > { %vm2340_vm9 = vmpackc.low %vm3146_vm1, %vm3137_vm15  ;;  %vm1206_vm15 = vcmp.lt.s32.totalorder %v3153_v46, %v3052_v34  ;;  %vm1009_vm1 = vcmp.ge.s32.totalorder %v3217_v43, %v3028_v24 }
 0x6e2   : > { %2341 = vmatprep.subr.msk.bf16.mxu0 %vm2340_vm9, %v2672_v28  ;;  %vm3172_vm3 = vmand %vm1183_vm0, %vm1204_vm11 }
 0x6e3   : > { %vm3178_vm6 = vmand %vm1184_vm7, %vm1205_vm2  ;;  %vm1028_vm7 = vcmp.lt.s32.totalorder %v3162_v47, %v3019_v26 }
 0x6e4   : > { %vm2372_vm13 = vmpackc.low %vm3178_vm6, %vm3172_vm3  ;;  %vm1208_vm6 = vcmp.lt.s32.totalorder %v3217_v43, %v3052_v34 }
 0x6e5   : > { %2371 = vmatpush3.bf16.xpose.msk.msra.mxu1 %vm2368_vm12, %v2672_v28  ;;  %vm3200_vm11 = vmand %vm1007_vm4, %vm1027_vm14  ;;  %vm1209_vm14 = vcmp.lt.s32.totalorder %v3236_v52, %v3052_v34 }
 0x6e6   : > { %2373 = vmatprep.subr.msk.bf16.mxu1 %vm2372_vm13, %v2672_v28  ;;  %vm3210_vm2 = vmand %vm1008_vm10, %vm1028_vm7  ;;  %vm1186_vm10 = vcmp.ge.s32.totalorder %v3162_v47, %v3039_v33  ;;  %vm1207_vm7 = vcmp.lt.s32.totalorder %v3162_v47, %v3052_v34 }
 0x6e7   : > { %2343 = vmatpush3.bf16.xpose.msk.msra.mxu0 %vm2340_vm9, %v2672_v28  ;;  %vm4271_vm4 = vmpackc.low %vm3210_vm2, %vm3200_vm11  ;;  %vm1029_vm9 = vcmp.lt.s32.totalorder %v3217_v43, %v3019_v26 }
 0x6e8   : > { %2345 = vmatprep.subr.msk.bf16.mxu0 %vm4271_vm4, %v2672_v28  ;;  %vm3254_vm12 = vmand %vm1185_vm5, %vm1206_vm15  ;;  %vm1030_vm5 = vcmp.lt.s32.totalorder %v3236_v52, %v3019_v26 }
 0x6e9   : > { %vm3260_vm0 = vmand %vm1186_vm10, %vm1207_vm7  ;;  %vm1187_vm7 = vcmp.ge.s32.totalorder %v3217_v43, %v3039_v33 }
 0x6ea   : > { %vm3272_vm15 = vmand %vm1009_vm1, %vm1029_vm9  ;;  %vm1188_vm9 = vcmp.ge.s32.totalorder %v3236_v52, %v3039_v33  ;;  %vm1012_vm1 = vcmp.ge.s32.totalorder %v3286_v59, %v3028_v24 }
 0x6eb   : > { %vm3279_vm10 = vmand %vm1010_vm8, %vm1030_vm5  ;;  %vm1189_vm5 = vcmp.ge.s32.totalorder %v3277_v57, %v3039_v33 }
 0x6ec   : > { %vm4272_vm8 = vmpackc.low %vm3260_vm0, %vm3254_vm12 }
 0x6ed   : > { %2375 = vmatpush3.bf16.xpose.msk.msra.mxu1 %vm2372_vm13, %v2672_v28  ;;  %vm2348_vm3 = vmpackc.low %vm3279_vm10, %vm3272_vm15  ;;  %vm1011_vm13 = vcmp.ge.s32.totalorder %v3277_v57, %v3028_v24  ;;  %vm1034_vm15 = vcmp.lt.s32.totalorder %v3308_v61, %v3019_v26 }
 0x6ee   : > { %2377 = vmatprep.subr.msk.bf16.mxu1 %vm4272_vm8, %v2672_v28  ;;  %vm4374_vm4 = vmpackc.low %vm3210_vm2, %vm3200_vm11  ;;  %vm1031_vm2 = vcmp.lt.s32.totalorder %v3277_v57, %v3019_v26 }
 0x6ef   : > { %2347 = vmatpush3.bf16.xpose.msk.msra.mxu0 %vm4374_vm4, %v2672_v28  ;;  %vm3339_vm8 = vmand %vm1187_vm7, %vm1208_vm6  ;;  %vm1032_vm6 = vcmp.lt.s32.totalorder %v3286_v59, %v3019_v26  ;;  %vm1210_vm7 = vcmp.lt.s32.totalorder %v3277_v57, %v3052_v34  ;;  %vm1013_vm4 = vcmp.ge.s32.totalorder %v3305_v60, %v3028_v24 }
 0x6f0   : > { %2349 = vmatprep.subr.msk.bf16.mxu0 %vm2348_vm3, %v2672_v28  ;;  %vm3357_vm11 = vmand %vm1188_vm9, %vm1209_vm14 }
 0x6f1   : > { %vm3375_vm14 = vmand %vm1011_vm13, %vm1031_vm2 }
 0x6f2   : > { %v4380_v2 = vsel %vm3375_vm14, 4294967295, %v4379_v2  ;;  %vm3379_vm9 = vmand %vm1012_vm1, %vm1032_vm6  ;;  %vm1190_vm1 = vcmp.ge.s32.totalorder %v3286_v59, %v3039_v33 }
 0x6f3   : > { %vm4273_vm13 = vmpackc.low %vm3357_vm11, %vm3339_vm8 }
 0x6f4   : > { %vm4383_vm2 = vmpackc.low %vm3260_vm0, %vm3254_vm12  ;;  %vm1211_vm0 = vcmp.lt.s32.totalorder %v3286_v59, %v3052_v34 }
 0x6f5   : > { %2379 = vmatpush3.bf16.xpose.msk.msra.mxu1 %vm4383_vm2, %v2672_v28  ;;  %vm3417_vm12 = vmand %vm1189_vm5, %vm1210_vm7  ;;  %vm1014_vm2 = vcmp.ge.s32.totalorder %v3308_v61, %v3028_v24  ;;  %vm1033_vm5 = vcmp.lt.s32.totalorder %v3305_v60, %v3019_v26  ;;  %vm1191_vm7 = vcmp.ge.s32.totalorder %v3305_v60, %v3039_v33 }
 0x6f6   : > { %2381 = vmatprep.subr.msk.bf16.mxu1 %vm4273_vm13, %v2672_v28  ;;  %vm3429_vm6 = vmand %vm1190_vm1, %vm1211_vm0  ;;  %vm1212_vm0 = vcmp.lt.s32.totalorder %v3305_v60, %v3052_v34 }
 0x6f7   : > { %2351 = vmatpush3.bf16.xpose.msk.msra.mxu0 %vm2348_vm3, %v2672_v28  ;;  %vm4388_vm13 = vmpackc.low %vm3379_vm9, %vm3375_vm14  ;;  %vm1192_vm3 = vcmp.ge.s32.totalorder %v3308_v61, %v3039_v33 }
 0x6f8   : > { %2353 = vmatprep.subr.msk.bf16.mxu0 %vm4388_vm13, %v2672_v28  ;;  %vm3445_vm10 = vmand %vm1013_vm4, %vm1033_vm5  ;;  %vm1213_vm13 = vcmp.lt.s32.totalorder %v3308_v61, %v3052_v34  ;;  %vm1015_vm5 = vcmp.ge.s32.totalorder %v3346_v63, %v3028_v24 }
 0x6f9   : > { %v4390_v6 = vsel %vm3445_vm10, 4294967295, %v4389_v6  ;;  %vm3452_vm1 = vmand %vm1014_vm2, %vm1034_vm15  ;;  %vm1194_vm15 = vcmp.ge.s32.totalorder %v3364_v0, %v3039_v33 }
 0x6fa   : > { %vm3460_vm14 = vmand %vm1191_vm7, %vm1212_vm0  ;;  %vm1193_vm0 = vcmp.ge.s32.totalorder %v3346_v63, %v3039_v33  ;;  %v3751_v33 = vld [vmem:[%s2805_s25 + $0x8] sm:$0xff] }
 0x6fb   : > { %v4394_v9 = vsel %vm3460_vm14, 4294967295, %v4393_v9  ;;  %vm3466_vm4 = vmand %vm1192_vm3, %vm1213_vm13  ;;  %vm1016_vm3 = vcmp.ge.s32.totalorder %v3364_v0, %v3028_v24  ;;  %vm4398_vm13 = vnez %v4380_v2  ;;  %v4443_v24 = vmov 0 }
 0x6fc   : > { %v4396_v12 = vsel %vm3466_vm4, 4294967295, %v4395_v12  ;;  %vm4275_vm2 = vmpackc.low %vm3429_vm6, %vm3417_vm12 }
 0x6fd   : > { %vm4397_vm7 = vmpackc.low %vm3357_vm11, %vm3339_vm8  ;;  %vm1035_vm11 = vcmp.lt.s32.totalorder %v3346_v63, %v3019_v26  ;;  %vm1036_vm8 = vcmp.lt.s32.totalorder %v3364_v0, %v3019_v26  ;;  %v4432_v26 = vmov 0 }
 0x6fe   : > { %2383 = vmatpush3.bf16.xpose.msk.msra.mxu1 %vm4397_vm7, %v2672_v28  ;;  %vm4399_vm7 = vmpackc.low %vm3379_vm9, %vm4398_vm13  ;;  %vm1214_vm9 = vcmp.lt.s32.totalorder %v3346_v63, %v3052_v34  ;;  %vm1358_vm13 = vcmp.ge.s32.totalorder %v2991_v53, %v3477_v13 }
 0x6ff   : > { %2385 = vmatprep.subr.msk.bf16.mxu1 %vm4275_vm2, %v2672_v28  ;;  %2355 = vmatpush3.bf16.xpose.msk.msra.mxu0 %vm4399_vm7, %v2672_v28  ;;  %vm3519_vm2 = vmand %vm1015_vm5, %vm1035_vm11  ;;  %vm1215_vm5 = vcmp.lt.s32.totalorder %v3364_v0, %v3052_v34  ;;  %v4458_v34 = vmov 0 }
 0x700   : > { %v4401_v16 = vsel %vm3519_vm2, 4294967295, %v4400_v16  ;;  %vm4402_vm14 = vmpackc.low %vm3452_vm1, %vm3445_vm10 }
 0x701   : > { %2357 = vmatprep.subr.msk.bf16.mxu0 %vm4402_vm14, %v2672_v28  ;;  %vm3531_vm4 = vmand %vm1016_vm3, %vm1036_vm8  ;;  %vm1359_vm14 = vcmp.ge.s32.totalorder %v3024_v27, %v3477_v13  ;;  %vm1379_vm8 = vcmp.lt.s32.totalorder %v2991_v53, %v3506_v14 }
 0x702   : > { %v4404_v1 = vsel %vm3531_vm4, 4294967295, %v4403_v1  ;;  %vm3539_vm11 = vmand %vm1193_vm0, %vm1214_vm9  ;;  %vm1537_vm0 = vcmp.ge.s32.totalorder %v2991_v53, %v3509_v15 }
 0x703   : > { %vm3545_vm7 = vmand %vm1194_vm15, %vm1215_vm5  ;;  %vm1380_vm15 = vcmp.lt.s32.totalorder %v3024_v27, %v3506_v14  ;;  %vm1538_vm5 = vcmp.ge.s32.totalorder %v3024_v27, %v3509_v15 }
 0x704   : > { %vm3561_vm9 = vmand %vm1358_vm13, %vm1379_vm8  ;;  %vm1558_vm13 = vcmp.lt.s32.totalorder %v2991_v53, %v3144_v44  ;;  %vm4414_vm8 = vnez %v4396_v12 }
 0x705   : > { %v4410_v19 = vsel %vm3561_vm9, 4294967295, %v4409_v19  ;;  %vm4411_vm3 = vmpackc.low %vm3429_vm6, %vm3417_vm12  ;;  %vm4415_vm9 = vnez %v4394_v9  ;;  %vm1360_vm12 = vcmp.ge.s32.totalorder %v3033_v31, %v3477_v13 }
 0x706   : > { %2387 = vmatpush3.bf16.xpose.msk.msra.mxu1 %vm4411_vm3, %v2672_v28  ;;  %vm3577_vm4 = vmand %vm1359_vm14, %vm1380_vm15  ;;  %vm4419_vm14 = vnez %v4390_v6  ;;  %vm4421_vm15 = vcmp.lt.s32.totalorder %v3024_v27, %v3144_v44  ;;  %v4436_v27 = vmov 0 }
 0x707   : > { %v4413_v20 = vsel %vm3577_vm4, 4294967295, %v4412_v20  ;;  %vm4416_vm10 = vmpackc.low %vm4414_vm8, %vm4415_vm9 }
 0x708   : > { %2389 = vmatprep.subr.msk.bf16.mxu1 %vm4416_vm10, %v2672_v28  ;;  %vm3589_vm6 = vmand %vm1537_vm0, %vm1558_vm13  ;;  %vm1361_vm10 = vcmp.ge.s32.totalorder %v3036_v32, %v3477_v13  ;;  %vm4424_vm0 = vnez %v4404_v1  ;;  %vm4425_vm13 = vnez %v4401_v16 }
 0x709   : > { %v4418_v21 = vsel %vm3589_vm6, 4294967295, %v4417_v21  ;;  %vm4420_vm3 = vmpackc.low %vm3452_vm1, %vm4419_vm14  ;;  %vm1382_vm14 = vcmp.lt.s32.totalorder %v3036_v32, %v3506_v14  ;;  %vm4442_vm1 = vnez %v4413_v20 }
 0x70a   : > { %2359 = vmatpush3.bf16.xpose.msk.msra.mxu0 %vm4420_vm3, %v2672_v28  ;;  %vm3604_vm2 = vmand %vm1538_vm5, %vm4421_vm15  ;;  %vm1381_vm5 = vcmp.lt.s32.totalorder %v3033_v31, %v3506_v14  ;;  %vm1539_vm15 = vcmp.ge.s32.totalorder %v3033_v31, %v3509_v15 }
 0x70b   : > { %vm4426_vm4 = vmpackc.low %vm4424_vm0, %vm4425_vm13 }
 0x70c   : > { %2361 = vmatprep.subr.msk.bf16.mxu0 %vm4426_vm4, %v2672_v28  ;;  %vm3624_vm3 = vmand %vm1360_vm12, %vm1381_vm5  ;;  %vm1540_vm4 = vcmp.ge.s32.totalorder %v3036_v32, %v3509_v15  ;;  %vm4431_vm12 = vcmp.lt.s32.totalorder %v3033_v31, %v3144_v44  ;;  %v4451_v31 = vmov 0 }
 0x70d   : > { %v4428_v22 = vsel %vm3624_vm3, 4294967295, %v4427_v22  ;;  %vm3630_vm13 = vmand %vm1361_vm10, %vm1382_vm14  ;;  %vm4435_vm14 = vcmp.lt.s32.totalorder %v3036_v32, %v3144_v44  ;;  %vm1383_vm3 = vcmp.lt.s32.totalorder %v3093_v37, %v3506_v14  ;;  %v4454_v32 = vmov 0 }
 0x70e   : > { %v4430_v25 = vsel %vm3630_vm13, 4294967295, %v4429_v25  ;;  %vm3643_vm5 = vmand %vm1539_vm15, %vm4431_vm12  ;;  %vm1362_vm15 = vcmp.ge.s32.totalorder %v3093_v37, %v3477_v13 }
 0x70f   : > { %v4433_v26 = vsel %vm3643_vm5, 4294967295, %v4432_v26  ;;  %vm4434_vm10 = vmpackc.low %vm4414_vm8, %vm4415_vm9  ;;  %vm1363_vm8 = vcmp.ge.s32.totalorder %v3098_v38, %v3477_v13  ;;  %vm1541_vm9 = vcmp.ge.s32.totalorder %v3093_v37, %v3509_v15 }
 0x710   : > { %2391 = vmatpush3.bf16.xpose.msk.msra.mxu1 %vm4434_vm10, %v2672_v28  ;;  %vm3656_vm6 = vmand %vm1540_vm4, %vm4435_vm14  ;;  %vm4439_vm4 = vnez %v4401_v16  ;;  %vm4441_vm14 = vnez %v4410_v19 }
 0x711   : > { %v4437_v27 = vsel %vm3656_vm6, 4294967295, %v4436_v27  ;;  %vm4438_vm12 = vmpackc.low %vm3545_vm7, %vm3539_vm11  ;;  %vm4447_vm6 = vcmp.lt.s32.totalorder %v3093_v37, %v3144_v44  ;;  %v4468_v37 = vmov 0 }
 0x712   : > { %2393 = vmatprep.subr.msk.bf16.mxu1 %vm4438_vm12, %v2672_v28  ;;  %vm4440_vm10 = vmpackc.low %vm4424_vm0, %vm4439_vm4  ;;  %vm1384_vm0 = vcmp.lt.s32.totalorder %v3098_v38, %v3506_v14 }
 0x713   : > { %2363 = vmatpush3.bf16.xpose.msk.msra.mxu0 %vm4440_vm10, %v2672_v28  ;;  %vm4297_vm12 = vmpackc.low %vm4442_vm1, %vm4441_vm14  ;;  %vm1542_vm10 = vcmp.ge.s32.totalorder %v3098_v38, %v3509_v15 }
 0x714   : > { %2397 = vmatprep.subr.msk.bf16.mxu0 %vm4297_vm12, %v2672_v28  ;;  %vm3696_vm4 = vmand %vm1362_vm15, %vm1383_vm3  ;;  %vm1364_vm3 = vcmp.ge.s32.totalorder %v3153_v46, %v3477_v13  ;;  %vm4450_vm15 = vcmp.lt.s32.totalorder %v3098_v38, %v3144_v44  ;;  %v3809_v38 = vld [vmem:[%s2805_s25 + $0x18] sm:$0xff]  ;;  %s2673_s25 = smov [#allocation5]  }
 0x715   : > { %v4444_v24 = vsel %vm3696_vm4, 4294967295, %v4443_v24  ;;  %vm3702_vm5 = vmand %vm1363_vm8, %vm1384_vm0  ;;  %vm1365_vm8 = vcmp.ge.s32.totalorder %v3162_v47, %v3477_v13  ;;  %s2571_s0 = sshll.u32 %s2673_s25, 4  ;;  %s2572_s0 = int_to_ptr.vmem [resolvable:$false] %s2571_s0 }
 0x716   : > { %vm3709_vm13 = vmand %vm1541_vm9, %vm4447_vm6  ;;  %vm1385_vm9 = vcmp.lt.s32.totalorder %v3153_v46, %v3506_v14  ;;  %vm1543_vm6 = vcmp.ge.s32.totalorder %v3153_v46, %v3509_v15  ;;  %p2574_p0 = scmp.lt.s32.totalorder %s1749_s24, %s2572_s0 }
 0x717   : > { %v4449_v30 = vsel %vm3709_vm13, 4294967295, %v4448_v30  ;;  %vm3718_vm12 = vmand %vm1542_vm10, %vm4450_vm15  ;;  %vm1386_vm10 = vcmp.lt.s32.totalorder %v3162_v47, %v3506_v14  ;;  %vm4456_vm13 = vnez %v4418_v21 }
 0x718   : > { %v4452_v31 = vsel %vm3718_vm12, 4294967295, %v4451_v31  ;;  %vm4453_vm0 = vmpackc.low %vm3545_vm7, %vm3539_vm11  ;;  %vm1544_vm7 = vcmp.ge.s32.totalorder %v3162_v47, %v3509_v15 }
 0x719   : > { %2395 = vmatpush3.bf16.xpose.msk.msra.mxu1 %vm4453_vm0, %v2672_v28  ;;  %vm3738_vm15 = vmand %vm1364_vm3, %vm1385_vm9  ;;  %vm4461_vm9 = vnez %v4430_v25  ;;  %vm4464_vm0 = vcmp.lt.s32.totalorder %v3153_v46, %v3144_v44  ;;  %v4487_v46 = vmov 0 }
 0x71a   : > { %v4455_v32 = vsel %vm3738_vm15, 4294967295, %v4454_v32  ;;  %vm4457_vm12 = vmpackc.low %vm3604_vm2, %vm4456_vm13  ;;  %2213 = vmatmul.mubr.f32.vlgmr.msra.gmra.mrb[4].mxu0 %v3751_v33  ;;  %vm1545_vm15 = vcmp.ge.s32.totalorder %v3217_v43, %v3509_v15 }
 0x71b   : > { %2429 = vmatprep.subr.msk.bf16.mxu1 %vm4457_vm12, %v2672_v28  ;;  %vm3754_vm11 = vmand %vm1365_vm8, %vm1386_vm10  ;;  %2215 = vmatprep.mubr.f32.mxu0 %v3775_v35  ;;  %vm4467_vm8 = vcmp.lt.s32.totalorder %v3162_v47, %v3144_v44  ;;  %v4489_v47 = vmov 0 }
 0x71c   : > { %v4459_v34 = vsel %vm3754_vm11, 4294967295, %v4458_v34  ;;  %vm4460_vm3 = vmpackc.low %vm4442_vm1, %vm4441_vm14  ;;  %vm4462_vm1 = vnez %v4428_v22  ;;  %vm4478_vm11 = vcmp.lt.s32.totalorder %v3217_v43, %v3144_v44 }
 0x71d   : > { %2399 = vmatpush3.bf16.xpose.msk.msra.mxu0 %vm4460_vm3, %v2672_v28  ;;  %vm4463_vm14 = vmpackc.low %vm4461_vm9, %vm4462_vm1  ;;  %vm1366_vm3 = vcmp.ge.s32.totalorder %v3217_v43, %v3477_v13 }
 0x71e   : > { %2401 = vmatprep.subr.msk.bf16.mxu0 %vm4463_vm14, %v2672_v28  ;;  %vm3787_vm10 = vmand %vm1543_vm6, %vm4464_vm0  ;;  %vm1367_vm14 = vcmp.ge.s32.totalorder %v3236_v52, %v3477_v13  ;;  %vm1387_vm0 = vcmp.lt.s32.totalorder %v3217_v43, %v3506_v14  ;;  %2216 = vmatmul.mubr.f32.gmra.mrb[6].mxu0 %v3809_v38  ;;  %v4510_v43 = vmov 0 }
 0x71f   : > { %v4466_v36 = vsel %vm3787_vm10, 4294967295, %v4465_v36  ;;  %vm3796_vm12 = vmand %vm1544_vm7, %vm4467_vm8  ;;  %vm1388_vm7 = vcmp.lt.s32.totalorder %v3236_v52, %v3506_v14  ;;  %2288 = vmatprep.mubr.f32.mxu0 %v2566_v40  ;;  %vm1546_vm10 = vcmp.ge.s32.totalorder %v3236_v52, %v3509_v15 }
 0x720   : > { %v4469_v37 = vsel %vm3796_vm12, 4294967295, %v4468_v37  ;;  %vm3814_vm8 = vmand %vm1366_vm3, %vm1387_vm0  ;;  %2251 = vmatmul.mubr.f32.vlgmr.msra.gmra.mrb[4].mxu1 %v3751_v33 }
 0x721   : > { %v4471_v39 = vsel %vm3814_vm8, 4294967295, %v4470_v39  ;;  %vm3822_vm6 = vmand %vm1367_vm14, %vm1388_vm7  ;;  %2253 = vmatprep.mubr.f32.mxu1 %v3775_v35  ;;  %vm4475_vm14 = vnez %v4437_v27  ;;  %vm4476_vm7 = vnez %v4433_v26 }
 0x722   : > { %vm4474_vm3 = vmpackc.low %vm3604_vm2, %vm4456_vm13  ;;  %vm1368_vm2 = vcmp.ge.s32.totalorder %v3277_v57, %v3477_v13 }
 0x723   : > { %2431 = vmatpush3.bf16.xpose.msk.msra.mxu1 %vm4474_vm3, %v2672_v28  ;;  %vm4477_vm12 = vmpackc.low %vm4475_vm14, %vm4476_vm7 }
 0x724   : > { %2433 = vmatprep.subr.msk.bf16.mxu1 %vm4477_vm12, %v2672_v28  ;;  %vm3848_vm4 = vmand %vm1545_vm15, %vm4478_vm11  ;;  %vm4482_vm12 = vcmp.lt.s32.totalorder %v3236_v52, %v3144_v44  ;;  %vm1369_vm15 = vcmp.ge.s32.totalorder %v3286_v59, %v3477_v13  ;;  %vm4485_vm11 = vnez %v4444_v24  ;;  %2254 = vmatmul.mubr.f32.gmra.mrb[6].mxu1 %v3809_v38  ;;  %v4513_v52 = vmov 0 }
 0x725   : > { %v4480_v42 = vsel %vm3848_vm4, 4294967295, %v4479_v42  ;;  %vm4481_vm13 = vmpackc.low %vm4461_vm9, %vm4462_vm1  ;;  %vm1389_vm1 = vcmp.lt.s32.totalorder %v3277_v57, %v3506_v14  ;;  %2326 = vmatprep.mubr.f32.mxu1 %v2566_v40  ;;  %vm1548_vm9 = vcmp.ge.s32.totalorder %v3286_v59, %v3509_v15  ;;  %vm4495_vm4 = vcmp.lt.s32.totalorder %v3286_v59, %v3144_v44 }
 0x726   : > { %2403 = vmatpush3.bf16.xpose.msk.msra.mxu0 %vm4481_vm13, %v2672_v28  ;;  %vm3863_vm3 = vmand %vm1546_vm10, %vm4482_vm12  ;;  %vm1390_vm10 = vcmp.lt.s32.totalorder %v3286_v59, %v3506_v14 }
 0x727   : > { %v4484_v45 = vsel %vm3863_vm3, 4294967295, %v4483_v45  ;;  %vm4486_vm0 = vmpackc.low %vm3702_vm5, %vm4485_vm11 }
 0x728   : > { %2405 = vmatprep.subr.msk.bf16.mxu0 %vm4486_vm0, %v2672_v28  ;;  %vm3884_vm13 = vmand %vm1368_vm2, %vm1389_vm1  ;;  %vm1547_vm0 = vcmp.ge.s32.totalorder %v3277_v57, %v3509_v15  ;;  %vm4491_vm2 = vcmp.lt.s32.totalorder %v3277_v57, %v3144_v44 }
 0x729   : > { %v4488_v46 = vsel %vm3884_vm13, 4294967295, %v4487_v46  ;;  %vm3890_vm12 = vmand %vm1369_vm15, %vm1390_vm10  ;;  %vm1370_vm15 = vcmp.ge.s32.totalorder %v3305_v60, %v3477_v13 }
 0x72a   : > { %v4490_v47 = vsel %vm3890_vm12, 4294967295, %v4489_v47  ;;  %vm3903_vm1 = vmand %vm1547_vm0, %vm4491_vm2  ;;  %vm1371_vm0 = vcmp.ge.s32.totalorder %v3308_v61, %v3477_v13  ;;  %vm4498_vm2 = vnez %v4452_v31  ;;  %vm4499_vm12 = vnez %v4449_v30 }
 0x72b   : > { %v4493_v48 = vsel %vm3903_vm1, 4294967295, %v4492_v48  ;;  %vm4494_vm10 = vmpackc.low %vm4475_vm14, %vm4476_vm7  ;;  %vm4504_vm14 = vnez %v4459_v34  ;;  %vm4505_vm1 = vnez %v4455_v32 }
 0x72c   : > { %2435 = vmatpush3.bf16.xpose.msk.msra.mxu1 %vm4494_vm10, %v2672_v28  ;;  %vm3918_vm13 = vmand %vm1548_vm9, %vm4495_vm4  ;;  %vm1391_vm4 = vcmp.lt.s32.totalorder %v3305_v60, %v3506_v14  ;;  %vm1392_vm9 = vcmp.lt.s32.totalorder %v3308_v61, %v3506_v14 }
 0x72d   : > { %v4497_v49 = vsel %vm3918_vm13, 4294967295, %v4496_v49  ;;  %vm4500_vm3 = vmpackc.low %vm4498_vm2, %vm4499_vm12 }
 0x72e   : > { %2437 = vmatprep.subr.msk.bf16.mxu1 %vm4500_vm3, %v2672_v28  ;;  %vm4501_vm7 = vmpackc.low %vm3702_vm5, %vm4485_vm11  ;;  %vm1549_vm3 = vcmp.ge.s32.totalorder %v3305_v60, %v3509_v15  ;;  %vm1550_vm5 = vcmp.ge.s32.totalorder %v3308_v61, %v3509_v15 }
 0x72f   : > { %2407 = vmatpush3.bf16.xpose.msk.msra.mxu0 %vm4501_vm7, %v2672_v28  ;;  %vm3944_vm10 = vmand %vm1370_vm15, %vm1391_vm4  ;;  %vm4509_vm15 = vcmp.lt.s32.totalorder %v3305_v60, %v3144_v44 }
 0x730   : > { %v4503_v50 = vsel %vm3944_vm10, 4294967295, %v4502_v50  ;;  %vm4506_vm13 = vmpackc.low %vm4504_vm14, %vm4505_vm1 }
 0x731   : > { %2409 = vmatprep.subr.msk.bf16.mxu0 %vm4506_vm13, %v2672_v28  ;;  %vm3956_vm8 = vmand %vm1371_vm0, %vm1392_vm9  ;;  %vm1372_vm13 = vcmp.ge.s32.totalorder %v3346_v63, %v3477_v13  ;;  %vm4512_vm0 = vcmp.lt.s32.totalorder %v3308_v61, %v3144_v44  ;;  %vm1373_vm9 = vcmp.ge.s32.totalorder %v3364_v0, %v3477_v13 }
 0x732   : > { %vm3969_vm4 = vmand %vm1549_vm3, %vm4509_vm15  ;;  %vm1393_vm15 = vcmp.lt.s32.totalorder %v3346_v63, %v3506_v14  ;;  %vm1551_vm3 = vcmp.ge.s32.totalorder %v3346_v63, %v3509_v15 }
 0x733   : > { %v4511_v43 = vsel %vm3969_vm4, 4294967295, %v4510_v43  ;;  %vm3978_vm7 = vmand %vm1550_vm5, %vm4512_vm0  ;;  %vm1394_vm0 = vcmp.lt.s32.totalorder %v3364_v0, %v3506_v14  ;;  %vm4518_vm4 = vnez %v4469_v37 }
 0x734   : > { %v4514_v52 = vsel %vm3978_vm7, 4294967295, %v4513_v52  ;;  %vm4515_vm5 = vmpackc.low %vm4498_vm2, %vm4499_vm12  ;;  %vm4519_vm7 = vnez %v4466_v36  ;;  %vm1552_vm2 = vcmp.ge.s32.totalorder %v3364_v0, %v3509_v15 }
 0x735   : > { %2439 = vmatpush3.bf16.xpose.msk.msra.mxu1 %vm4515_vm5, %v2672_v28  ;;  %vm3998_vm11 = vmand %vm1372_vm13, %vm1393_vm15  ;;  %vm4526_vm5 = vcmp.lt.s32.totalorder %v3346_v63, %v3144_v44 }
 0x736   : > { %vm4520_vm10 = vmpackc.low %vm4518_vm4, %vm4519_vm7 }
 0x737   : > { %2441 = vmatprep.subr.msk.bf16.mxu1 %vm4520_vm10, %v2672_v28  ;;  %vm4010_vm12 = vmand %vm1373_vm9, %vm1394_vm0  ;;  %vm4524_vm10 = vnez %v4471_v39 }
 0x738   : > { %vm4523_vm13 = vmpackc.low %vm4504_vm14, %vm4505_vm1  ;;  %vm4529_vm1 = vcmp.lt.s32.totalorder %v3364_v0, %v3144_v44 }
 0x739   : > { %2411 = vmatpush3.bf16.xpose.msk.msra.mxu0 %vm4523_vm13, %v2672_v28  ;;  %vm2424_vm15 = vmpackc.low %vm4010_vm12, %vm3998_vm11  ;;  %vm4537_vm13 = vnez %v4490_v47 }
 0x73a   : > { %vm4525_vm9 = vmpackc.low %vm3822_vm6, %vm4524_vm10 }
 0x73b   : > { %2413 = vmatprep.subr.msk.bf16.mxu0 %vm4525_vm9, %v2672_v28  ;;  %vm4035_vm0 = vmand %vm1551_vm3, %vm4526_vm5  ;;  %vm4533_vm9 = vnez %v4484_v45 }
 0x73c   : > { %vm4042_vm14 = vmand %vm1552_vm2, %vm4529_vm1  ;;  %vm4534_vm2 = vnez %v4480_v42 }
 0x73d   : > { %vm4532_vm3 = vmpackc.low %vm4518_vm4, %vm4519_vm7  ;;  %vm4538_vm4 = vnez %v4488_v46 }
 0x73e   : > { %2443 = vmatpush3.bf16.xpose.msk.msra.mxu1 %vm4532_vm3, %v2672_v28  ;;  %vm4535_vm5 = vmpackc.low %vm4533_vm9, %vm4534_vm2  ;;  %vm4544_vm9 = vnez %v4503_v50 }
 0x73f   : > { %2445 = vmatprep.subr.msk.bf16.mxu1 %vm4535_vm5, %v2672_v28  ;;  %vm4536_vm1 = vmpackc.low %vm3822_vm6, %vm4524_vm10  ;;  %vm4542_vm6 = vnez %v4493_v48 }
 0x740   : > { %vm4539_vm7 = vmpackc.low %vm4537_vm13, %vm4538_vm4  ;;  %v977_v44 = vpop.permute.xlu1 %976  ;;  %vm4547_vm13 = vnez %v4514_v52  ;;  %vm4548_vm4 = vnez %v4511_v43 }
 0x741   : > { %2415 = vmatpush3.bf16.xpose.msk.msra.mxu0 %vm4536_vm1, %v2672_v28  ;;  %vm4540_vm3 = vmmov %vm4535_vm5  ;;  %vm4541_vm5 = vnez %v4497_v49  ;;  %vm978_vm1 = vcmask 0  }
 0x742   : > { %2417 = vmatprep.subr.msk.bf16.mxu0 %vm4539_vm7, %v2672_v28  ;;  %vm4543_vm10 = vmpackc.low %vm4541_vm5, %vm4542_vm6  ;;  %979 = vst.msk [vmem:[%s458_s23] sm:$0x1] %vm978_vm1, %v977_v44  ;;  %s2573_s23 = scalar_lea.vmem %s2572_s0, 32 }
 0x743   : > { %vm4545_vm2 = vmpackc.low %vm3956_vm8, %vm4544_vm9  ;;  %p2575_p1 = scmp.lt.s32.totalorder %s2573_s23, %s2567_s1 }
 0x744   : > { %vm4550_vm1 = vmmov %vm4545_vm2 }
 0x745   : > { %vm4552_vm8 = vmpackc.low %vm4042_vm14, %vm4035_vm0  ;;  %p2576_p2 = por %p2575_p1, %p2574_p0 }
 0x746   : > { %2447 = vmatpush3.bf16.xpose.msk.msra.mxu1 %vm4540_vm3, %v2672_v28  ;;  %vm4546_vm3 = vmmov %vm4543_vm10 }
 0x747   : > { %2449 = vmatprep.subr.msk.bf16.mxu1 %vm4543_vm10, %v2672_v28  ;;  %vm4549_vm10 = vmpackc.low %vm4547_vm13, %vm4548_vm4  ;;  %p2577_p3 = pnand %p2576_p2, %p2570_p13 }
 0x748   : > { %vm4551_vm5 = vmmov %vm4549_vm10 }
 0x749   : > { %2419 = vmatpush3.bf16.xpose.msk.msra.mxu0 %vm4539_vm7, %v2672_v28  ;;  %vm4553_vm6 = vmmov %vm4552_vm8 }
 0x74a   : > { %2421 = vmatprep.subr.msk.bf16.mxu0 %vm4545_vm2, %v2672_v28 }
 0x74e   : > { %2451 = vmatpush3.bf16.xpose.msk.msra.mxu1 %vm4546_vm3, %v2672_v28 }
 0x74f   : > { %2453 = vmatprep.subr.msk.bf16.mxu1 %vm4549_vm10, %v2672_v28 }
 0x751   : > { %2423 = vmatpush3.bf16.xpose.msk.msra.mxu0 %vm4550_vm1, %v2672_v28 }
 0x752   : > { %2425 = vmatprep.subr.msk.bf16.mxu0 %vm2424_vm15, %v2672_v28 }
 0x756   : > { %2455 = vmatpush3.bf16.xpose.msk.msra.mxu1 %vm4551_vm5, %v2672_v28 }
 0x757   : > { %2457 = vmatprep.subr.msk.bf16.mxu1 %vm4552_vm8, %v2672_v28 }
 0x759   : > { %2427 = vmatpush3.bf16.xpose.msk.msra.mxu0 %vm2424_vm15, %v2672_v28 }
 0x75e   : > { %2459 = vmatpush3.bf16.xpose.msk.msra.mxu1 %vm4553_vm6, %v2672_v28 }
 0x760   : > { %2289 = vmatmul.mubr.f32.vlgmr.msra.gmra.mrb[8].mxu0 %v3751_v33 }
 0x761   : > { %2291 = vmatprep.mubr.f32.mxu0 %v3775_v35 }
 0x764   : > { %2292 = vmatmul.mubr.f32.gmra.mrb[10].mxu0 %v3809_v38 }
 0x765   : > { %2327 = vmatmul.mubr.f32.vlgmr.msra.gmra.mrb[8].mxu1 %v3751_v33 }
 0x766   : > { %2329 = vmatprep.mubr.f32.mxu1 %v3775_v35 }
 0x769   : > { %2330 = vmatmul.mubr.f32.gmra.mrb[10].mxu1 %v3809_v38 }
 0x76a   : > { %2580 = shalt.err (!%p2577_p3)
}
 0x76b   : > { %s2581_s26 = scalar_lea.hbm %s4162_s16, 16  ;;  %s2585_s14 = scalar_lea.hbm %s4264_s12, 32 }
 0x76c   : > { %p2582_p4 = scmp.ne.s32.totalorder %s4162_s16, %s2581_s26  ;;  %p2586_p9 = scmp.lt.u32.totalorder %s4162_s16, %s4264_s12 }
 0x76d   : > { %p2587_p10 = scmp.lt.u32.totalorder %s2585_s14, %s2581_s26  ;;  %p2589_p12 = scmp.lt.u32.totalorder %s2581_s26, %s4162_s16 }
 0x76e   : > { %p2583_p7 = pnand %p2582_p4, %p2787_p5 }
 0x76f   : > { %p2588_p11 = por %p2587_p10, %p2586_p9 }
 0x770   : > { %p2584_p8 = pneg %p2583_p7 }
 0x771   : > { %p2590_p13 = por %p2589_p12, %p2588_p11 }
 0x773   : > { %p2591_p0 = pnand %p2590_p13, %p2584_p8 }
 0x775   : > { %2594 = shalt.err (!%p2591_p0)
}
 0x776   : > { %2463 = dma.vmem_to_hbm [thread:$0]  (%p2787_p5), %s1749_s24, 16, %s4162_s16, %s1717_s17  }
 0x777   : > { %s1861_s1 = sshll.u32 %s2998_s18, 7  ;;  %s2049_s24 = sshll.u32 %s2770_s10, 11 }
 0x778   : > { %s4183_s23 = scalar_lea.vmem [#allocation3], %s1861_s1  ;;  %s4204_s21 = scalar_lea.hbm %s4263_s11, %s2049_s24 }
 0x779   : > { %s1732_s16 = sshll.u32 %s4183_s23, 4  ;;  %s1712_s29 = scalar_lea.sflag [#allocation4], %s2998_s18  ;;  %s4206_s16 = int_to_ptr.vmem [resolvable:$true] %s1732_s16 }
 0x77a   : > { %s2595_s10 = scalar_lea.vmem %s4206_s16, 2048  ;;  %s2674_s14 = smov [#allocation3]  }
 0x77b   : > { %p2596_p1 = scmp.ne.s32.totalorder %s4206_s16, %s2595_s10  ;;  %s2599_s25 = sshll.u32 %s2674_s14, 4  ;;  %s2600_s25 = int_to_ptr.vmem [resolvable:$false] %s2599_s25 }
 0x77c   : > { %s2601_s0 = scalar_lea.vmem %s2600_s25, 4096  ;;  %p2602_p4 = scmp.lt.s32.totalorder %s4206_s16, %s2600_s25 }
 0x77d   : > { %p2597_p2 = pnand %p2596_p1, %p2787_p5  ;;  %p2603_p7 = scmp.lt.s32.totalorder %s2601_s0, %s2595_s10 }
 0x77f   : > { %p2598_p3 = pneg %p2597_p2  ;;  %p2604_p8 = por %p2603_p7, %p2602_p4 }
 0x781   : > { %p2605_p9 = pnand %p2604_p8, %p2598_p3 }
 0x7ed   : > { %v2214_v28 = vpop.f32.mrb[4].mxu0 }
 0x7ee   : > { %1171 = vst [vmem:[%s4183_s23 + $0x20] sm:$0xff] %v2214_v28  ;;  %v1151_v58 = vpop.f32.mrb[5].mxu0 }
 0x7ef   : > { %1170 = vst [vmem:[%s4183_s23] sm:$0xff] %v1151_v58 }
 0x7f1   : > { %v2217_v59 = vpop.f32.mrb[6].mxu0 }
 0x7f2   : > { %1173 = vst [vmem:[%s4183_s23 + $0x60] sm:$0xff] %v2217_v59  ;;  %v1161_v60 = vpop.f32.mrb[7].mxu0 }
 0x7f3   : > { %v2252_v61 = vpop.f32.mrb[4].mxu1  ;;  %1172 = vst [vmem:[%s4183_s23 + $0x40] sm:$0xff] %v1161_v60 }
 0x7f4   : > { %1350 = vst [vmem:[%s4183_s23 + $0x28] sm:$0xff] %v2252_v61  ;;  %v1330_v62 = vpop.f32.mrb[5].mxu1 }
 0x7f5   : > { %1349 = vst [vmem:[%s4183_s23 + $0x8] sm:$0xff] %v1330_v62 }
 0x7f7   : > { %v2255_v63 = vpop.f32.mrb[6].mxu1 }
 0x7f8   : > { %1352 = vst [vmem:[%s4183_s23 + $0x68] sm:$0xff] %v2255_v63  ;;  %v1340_v23 = vpop.f32.mrb[7].mxu1 }
 0x7f9   : > { %1351 = vst [vmem:[%s4183_s23 + $0x48] sm:$0xff] %v1340_v23 }
 0x833   : > { %v2290_v0 = vpop.f32.mrb[8].mxu0 }
 0x834   : > { %1529 = vst [vmem:[%s4183_s23 + $0x30] sm:$0xff] %v2290_v0  ;;  %v1509_v2 = vpop.f32.mrb[9].mxu0 }
 0x835   : > { %1528 = vst [vmem:[%s4183_s23 + $0x10] sm:$0xff] %v1509_v2 }
 0x837   : > { %v2293_v3 = vpop.f32.mrb[10].mxu0 }
 0x838   : > { %1531 = vst [vmem:[%s4183_s23 + $0x70] sm:$0xff] %v2293_v3  ;;  %v1519_v4 = vpop.f32.mrb[11].mxu0  ;;  %v2328_v5 = vpop.f32.mrb[8].mxu1 }
 0x839   : > { %1530 = vst [vmem:[%s4183_s23 + $0x50] sm:$0xff] %v1519_v4  ;;  %1708 = vst [vmem:[%s4183_s23 + $0x38] sm:$0xff] %v2328_v5  ;;  %v1688_v6 = vpop.f32.mrb[9].mxu1 }
 0x83a   : > { %1707 = vst [vmem:[%s4183_s23 + $0x18] sm:$0xff] %v1688_v6 }
 0x83c   : > { %v2331_v7 = vpop.f32.mrb[10].mxu1 }
 0x83d   : > { %1710 = vst [vmem:[%s4183_s23 + $0x78] sm:$0xff] %v2331_v7  ;;  %v1698_v8 = vpop.f32.mrb[11].mxu1 }
 0x83e   : > { %1709 = vst [vmem:[%s4183_s23 + $0x58] sm:$0xff] %v1698_v8 }
 0x83f   : > { %2608 = shalt.err (!%p2605_p9)
}
 0x840   : > { %s2609_s1 = scalar_lea.hbm %s4204_s21, 2048  ;;  %s2613_s17 = scalar_lea.hbm %s4263_s11, 4096 }
 0x841   : > { %p2610_p10 = scmp.ne.s32.totalorder %s4204_s21, %s2609_s1  ;;  %p2614_p13 = scmp.lt.u32.totalorder %s4204_s21, %s4263_s11 }
 0x842   : > { %p2615_p0 = scmp.lt.u32.totalorder %s2613_s17, %s2609_s1  ;;  %p2617_p2 = scmp.lt.u32.totalorder %s2609_s1, %s4204_s21 }
 0x843   : > { %p2611_p11 = pnand %p2610_p10, %p2787_p5 }
 0x844   : > { %p2616_p1 = por %p2615_p0, %p2614_p13 }
 0x845   : > { %p2612_p12 = pneg %p2611_p11 }
 0x846   : > { %p2618_p3 = por %p2617_p2, %p2616_p1 }
 0x848   : > { %p2619_p4 = pnand %p2618_p3, %p2612_p12 }
 0x84a   : > { %2622 = shalt.err (!%p2619_p4)
}
 0x84b   : > { %s2675_s10 = smov 512  }
 0x84c   : > { %2462 = dma.vmem_to_hbm [thread:$0]  (%p2787_p5), %s4206_s16, 2048, %s4204_s21, %s1712_s29, %s2675_s10, %s2675_s10, %s2670_s22  }
 0x84d PF: > { %p2473_p7 = scmp.ge.s32.totalorder %s2661_s30, 2  ;;  %s1763_s25 = sand.u32 1, %s2649_s27  }
 0x84e   : > { %s1764_s0 = scalar_lea.sflag [#allocation4], %s1763_s25 }
 0x84f   : > { %p2467_p8 = pnand %p2473_p7, %p2791_p6 }
 0x851   : > { %2640 = dma.done.wait (!%p2467_p8), %s1764_s0, 2048  }
 0x852   : > { %2642 = vsyncadd (!%p2467_p8), %s1764_s0, 4294965248  ;;  %s1773_s1 = scalar_lea.sflag [#allocation6], %s1763_s25 }
 0x853   : > { %2644 = dma.done.wait (!%p2467_p8), %s1773_s1, 16  }
 0x854   : > { %2646 = vsyncadd (!%p2467_p8), %s1773_s1, 4294967280  ;;  %s4554_s19 = sld [smem:[#allocation9_spill]]  ;;  %s4555_s29 = sld [smem:[#allocation10_spill]] }
 0x855   : > { %p29_p5 = scmp.ge.s32.totalorder %s2774_s15, 4   ;;  %s4556_s27 = smov %s2653_s28 }
 0x856   : > { %s4558_s30 = smov %s2774_s15 }
 0x857   :  { %31 = sbr.rel (!%p29_p5) target bundleno = 8 (0x8), region = 128 }
 0x85a   : > { %s4557_s28 = smov %s4554_s19 }
 0x85e   :  { %1783 = vsyncpa [#allocation4], 1 }
 0x85f   :  { %1785 = vsyncpa [#allocation4 + $0x1], 1 }
 0x860   :  { %1786 = vsyncpa [#allocation6], 1 }
 0x861   :  { %1788 = vsyncpa [#allocation6 + $0x1], 1 }

</bundles_post_ra>
